<compile_context>
chip_gen: v7x
topology: tpu7x:2x2x1
jax: 0.10.0
libtpu: 0.0.40
codegen_flags: <defaults>
</compile_context>

<pallas_src>
import functools

import jax
import jax.numpy as jnp
from jax.experimental import pallas as pl
from jax.experimental.pallas import tpu as pltpu


# ---------------------------------------------------------------------------
# Helpers
# ---------------------------------------------------------------------------

def _round_hidden(dim: int, hidden_dim: int, multiple_of: int,
                  ffn_dim_multiplier=None) -> int:
    """Mirror of the PyTorch module's hidden-dim rounding rule."""
    hidden_dim = int(2 * hidden_dim / 3)
    if ffn_dim_multiplier is not None:
        hidden_dim = int(ffn_dim_multiplier * hidden_dim)
    hidden_dim = multiple_of * ((hidden_dim + multiple_of - 1) // multiple_of)
    return hidden_dim


def _round_up(x: int, m: int) -> int:
    return ((x + m - 1) // m) * m


def _pick_hidden_tile(H: int, desired: int, align: int = 128) -> int:
    """Largest multiple of `align` dividing H that is <= desired (else H)."""
    if H <= desired or H % align != 0:
        return H
    t = (min(desired, H) // align) * align
    while t >= align and H % t != 0:
        t -= align
    return t if t >= align else H


def _pick_token_tile(N: int, desired: int, pack: int) -> int:
    """Token tile: multiple of the dtype sublane packing; prefer a divisor of N."""
    desired = max(pack, (desired // pack) * pack)
    if N <= desired:
        return _round_up(N, pack)
    if N % desired == 0:
        return desired
    # Prefer a divisor of N (>= half the desired tile) so the wrapper never has
    # to pad/slice the activation tensor through HBM.
    floor = max(pack, ((desired // 2) // pack) * pack)
    t = desired
    while t >= floor:
        if N % t == 0:
            return t
        t -= pack
    return desired  # fall back to padding N


def _vmem_need(tm: int, th: int, D: int, xb: int, wb: int) -> int:
    """Rough double-buffered VMEM footprint estimate in bytes."""
    return (2 * tm * D * xb                      # x tiles
            + 2 * tm * D * xb                    # output tiles
            + 2 * (D * 2 * th + th * D) * wb     # fused W13 + W2 tiles
            + tm * D * 4                         # f32 accumulator
            + tm * 2 * th * 4                    # h13 intermediate (f32)
            + tm * th * 4)                       # gated intermediate headroom


def _device_defaults():
    """Per-generation (tm, th) defaults and physical VMEM capacity."""
    kind = ""
    try:
        kind = jax.devices()[0].device_kind.lower()
    except Exception:  # pragma: no cover - defensive
        pass

    vmem_cap = None
    try:
        vmem_cap = int(getattr(pltpu.get_tpu_info(), "vmem_capacity_bytes", 0)) or None
    except Exception:  # pragma: no cover - defensive
        vmem_cap = None

    if "v7" in kind:
        tm, th = 512, 256                       # 64 MiB VMEM / TC, 3.2 TB/s HBM
        cap = vmem_cap or 64 * 1024 * 1024
    elif "v6" in kind:
        tm, th = 1024, 512                      # needs ~650 flops/byte to be MXU-bound
        cap = vmem_cap or 128 * 1024 * 1024
    elif "v5" in kind:
        tm, th = 512, 512                       # roofline crossover ~240 flops/byte
        cap = vmem_cap or 128 * 1024 * 1024
    else:
        tm, th = 512, 256                       # conservative / portable default
        cap = vmem_cap or 64 * 1024 * 1024
    return tm, th, cap


# ---------------------------------------------------------------------------
# Kernel
# ---------------------------------------------------------------------------

def _ffn_kernel(x_ref, w13_ref, w2_ref, o_ref, acc_ref, *, th: int):
    # x_ref  : (tm, D)      token tile (resident across the h axis)
    # w13_ref: (D, 2*th)    fused [gate | up] weight tile (interleaved per h)
    # w2_ref : (th, D)      down-proj weight tile
    # o_ref  : (tm, D)      output tile (written on last h step)
    # acc_ref: (tm, D)      f32 accumulator scratch
    h = pl.program_id(1)

    @pl.when(h == 0)
    def _():
        acc_ref[...] = jnp.zeros_like(acc_ref)

    x = x_ref[...]
    # One fused MXU pass for the gate and up projections.
    h13 = jnp.dot(x, w13_ref[...], preferred_element_type=jnp.float32)
    h1 = h13[:, :th]     # gate (x @ W1^T tile)
    h3 = h13[:, th:]     # up   (x @ W3^T tile)

    # SiLU: h1 * sigmoid(h1).  exp + approximate reciprocal both run on the
    # EUP slot, keeping the VALU free once the kernel is MXU-bound.
    gated = (h1 * pl.reciprocal(1.0 + jnp.exp(-h1), approx=True)) * h3

    acc_ref[...] += jnp.dot(gated.astype(w2_ref.dtype), w2_ref[...],
                            preferred_element_type=jnp.float32)

    @pl.when(h == pl.num_programs(1) - 1)
    def _():
        o_ref[...] = acc_ref[...].astype(o_ref.dtype)


@functools.partial(jax.jit, static_argnames=("tm", "th", "vmem_limit"))
def _ffn_pallas(x, w1_t, w3_t, w2_t, *, tm: int, th: int, vmem_limit: int):
    B, S, D = x.shape
    H = w1_t.shape[1]
    N = B * S
    x2d = x.reshape(N, D)

    # Pad tokens only if no divisor tile was found (usually a no-op).
    # TODO(synk): mask the ragged last token tile in-kernel instead of padding.
    N_pad = _round_up(N, tm)
    if N_pad != N:
        x2d = jnp.pad(x2d, ((0, N_pad - N), (0, 0)))

    # Fuse W1/W3 into one interleaved (D, 2H) stream so each h-block holds
    # [W1 tile h | W3 tile h].  In production, pre-materialize this once.
    Ht = H // th
    w13 = jnp.concatenate(
        [w1_t.reshape(D, Ht, 1, th), w3_t.reshape(D, Ht, 1, th)],
        axis=2).reshape(D, 2 * H)

    grid = (N_pad // tm, Ht)

    # Advisory cost estimate: 3 matmuls of N*D*H MACs; one transcendental per
    # hidden activation; weights fully re-streamed per token tile.
    w_bytes = (2 * D * H + H * D) * jnp.dtype(w1_t.dtype).itemsize
    cost = pl.CostEstimate(
        flops=6 * N_pad * D * H,
        transcendentals=N_pad * H,
        bytes_accessed=2 * N_pad * D * jnp.dtype(x.dtype).itemsize
        + grid[0] * w_bytes,
    )

    out2d = pl.pallas_call(
        functools.partial(_ffn_kernel, th=th),
        out_shape=jax.ShapeDtypeStruct((N_pad, D), x.dtype),
        grid_spec=pltpu.PrefetchScalarGridSpec(
            num_scalar_prefetch=0,
            grid=grid,
            in_specs=[
                pl.BlockSpec((tm, D), lambda i, h: (i, 0)),       # x (h-invariant)
                pl.BlockSpec((D, 2 * th), lambda i, h: (0, h)),   # fused W1|W3 tile
                pl.BlockSpec((th, D), lambda i, h: (h, 0)),       # W2 tile
            ],
            out_specs=pl.BlockSpec((tm, D), lambda i, h: (i, 0)),
            scratch_shapes=[pltpu.VMEM((tm, D), jnp.float32)],
        ),
        compiler_params=pltpu.CompilerParams(
            dimension_semantics=("parallel", "arbitrary"),
            vmem_limit_bytes=vmem_limit,
        ),
        cost_estimate=cost,
    )(x2d, w13, w2_t)

    if N_pad != N:
        out2d = out2d[:N]
    return out2d.reshape(B, S, D)


def simple_feed_forward(x, w1_t, w3_t, w2_t, *, tm=None, th=None):
    """x: (B, S, D). w1_t/w3_t: (D, H). w2_t: (H, D). Returns (B, S, D).

    Run bf16 activations/weights for MXU peak (f32 accumulation in-kernel).
    """
    B, S, D = x.shape
    H = w1_t.shape[1]
    N = B * S

    tm_def, th_def, vmem_cap = _device_defaults()
    if tm is None:
        tm = tm_def
    if th is None:
        th = th_def

    xb = jnp.dtype(x.dtype).itemsize
    wb = jnp.dtype(w1_t.dtype).itemsize
    pack = max(8, 32 // xb)               # sublane packing: f32->8, bf16->16, i8/fp8->32

    tm_eff = _pick_token_tile(N, tm, pack)
    th_eff = _pick_hidden_tile(H, th)     # multiple of 128 dividing H (else H)

    # Device-aware VMEM clamp: never ask for more than ~80% of physical VMEM
    # (v7x only has 64 MiB per TensorCore); shrink tiles until we fit.
    budget = int(0.80 * vmem_cap)
    for _ in range(8):
        if _vmem_need(tm_eff, th_eff, D, xb, wb) <= budget:
            break
        if tm_eff > 2 * pack:
            tm_eff = max(pack, ((tm_eff // 2) // pack) * pack)
        elif th_eff > 128 and H % 128 == 0:
            th_eff = _pick_hidden_tile(H, max(128, th_eff // 2))
        else:
            break  # TODO(synk): stream D as well if a single row of tiles can't fit.
    need = _vmem_need(tm_eff, th_eff, D, xb, wb)
    vmem_limit = int(min(budget, max(32 * 1024 * 1024, int(1.5 * need))))

    return _ffn_pallas(x, w1_t, w3_t, w2_t,
                       tm=tm_eff, th=th_eff, vmem_limit=vmem_limit)


# ---------------------------------------------------------------------------
# Reference + test
# ---------------------------------------------------------------------------

def _reference(x, w1_t, w3_t, w2_t):
    x1 = x @ w1_t
    x3 = x @ w3_t
    return (jax.nn.silu(x1) * x3) @ w2_t


if __name__ == "__main__":
    # Small shapes consistent with the module's construction rules.
    dim = 256
    hidden_dim = _round_hidden(dim, 4 * dim, 256)   # -> 768
    B, S = 2, 8

    key = jax.random.PRNGKey(0)
    kx, k1, k3, k2 = jax.random.split(key, 4)

    x = jax.random.normal(kx, (B, S, dim), dtype=jnp.float32)
    scale1 = 1.0 / jnp.sqrt(dim)
    scale2 = 1.0 / jnp.sqrt(hidden_dim)
    w1_t = jax.random.normal(k1, (dim, hidden_dim), dtype=jnp.float32) * scale1
    w3_t = jax.random.normal(k3, (dim, hidden_dim), dtype=jnp.float32) * scale1
    w2_t = jax.random.normal(k2, (hidden_dim, dim), dtype=jnp.float32) * scale2

    # f32 path (approx-reciprocal SiLU -> slightly relaxed tolerance).
    out = jax.block_until_ready(simple_feed_forward(x, w1_t, w3_t, w2_t))
    ref = _reference(x, w1_t, w3_t, w2_t)
    assert out.shape == (B, S, dim)
    assert jnp.allclose(out, ref, atol=5e-3, rtol=5e-3), "f32 mismatch vs reference"

    # bf16 path (hits the bf16 MXU peak on v5e/v6e/v7x; f32 accumulation in-kernel).
    xb_, w1b, w3b, w2b = (a.astype(jnp.bfloat16) for a in (x, w1_t, w3_t, w2_t))
    out_bf = jax.block_until_ready(simple_feed_forward(xb_, w1b, w3b, w2b))
    ref_bf = _reference(xb_.astype(jnp.float32), w1b.astype(jnp.float32),
                        w3b.astype(jnp.float32), w2b.astype(jnp.float32))
    assert out_bf.shape == (B, S, dim)
    assert jnp.allclose(out_bf.astype(jnp.float32), ref_bf, atol=5e-2, rtol=5e-2), \
        "bf16 mismatch vs reference"

    print("KERNEL_OK")
</pallas_src>

<mosaic_0001>
module attributes {stable_mosaic.version = 11 : i64} {
  func.func @_ffn_kernel(%arg0: i32, %arg1: i32, %arg2: memref<16x256xf32, #tpu.memory_space<vmem>>, %arg3: memref<256x512xf32, #tpu.memory_space<vmem>>, %arg4: memref<256x256xf32, #tpu.memory_space<vmem>>, %arg5: memref<16x256xf32, #tpu.memory_space<vmem>>, %arg6: memref<16x256xf32, #tpu.memory_space<vmem>>) attributes {dimension_semantics = [#tpu.dimension_semantics<parallel>, #tpu.dimension_semantics<arbitrary>], iteration_bounds = array<i64: 1, 3>, scalar_prefetch = 0 : i64, scratch_operands = 1 : i64, tpu.core_type = #tpu.core_type<tc>, window_params = [{transform_indices = @transform_0, window_bounds = array<i64: 16, 256>}, {transform_indices = @transform_1, window_bounds = array<i64: 256, 512>}, {transform_indices = @transform_2, window_bounds = array<i64: 256, 256>}, {transform_indices = @transform_3, window_bounds = array<i64: 16, 256>}]} {
    %c0_i32 = arith.constant 0 : i32
    %0 = arith.cmpi eq, %arg1, %c0_i32 : i32
    %1 = arith.extui %0 : i1 to i32
    %c0_i32_0 = arith.constant 0 : i32
    %2 = arith.cmpi ne, %1, %c0_i32_0 : i32
    scf.if %2 {
      %cst_14 = arith.constant 0.000000e+00 : f32
      %24 = vector.broadcast %cst_14 : f32 to vector<16x256xf32>
      %c0_15 = arith.constant 0 : index
      %c0_16 = arith.constant 0 : index
      %25 = vector.load %arg6[%c0_15, %c0_16] : memref<16x256xf32, #tpu.memory_space<vmem>>, vector<16x256xf32>
      tpu.vector_store %arg6[%c0_15, %c0_16], %24 {strides = array<i32>} : memref<16x256xf32, #tpu.memory_space<vmem>>, vector<16x256xf32>,
    } else {
    }
    %c0 = arith.constant 0 : index
    %c0_1 = arith.constant 0 : index
    %3 = vector.load %arg2[%c0, %c0_1] : memref<16x256xf32, #tpu.memory_space<vmem>>, vector<16x256xf32>
    %c0_2 = arith.constant 0 : index
    %c0_3 = arith.constant 0 : index
    %4 = vector.load %arg3[%c0_2, %c0_3] : memref<256x512xf32, #tpu.memory_space<vmem>>, vector<256x512xf32>
    %cst = arith.constant dense<0.000000e+00> : vector<16x512xf32>
    %5 = tpu.matmul %3, %4, %cst {dimension_numbers = #tpu.dot_dimension_numbers<[1], [0], [0], [1], [0, 0, 1, 1], [], []>} : vector<16x256xf32>, vector<256x512xf32>, vector<16x512xf32> -> vector<16x512xf32>
    %6 = vector.extract_strided_slice %5 {offsets = [0, 0], sizes = [16, 256], strides = [1, 1]} : vector<16x512xf32> to vector<16x256xf32>
    %7 = vector.extract_strided_slice %5 {offsets = [0, 256], sizes = [16, 256], strides = [1, 1]} : vector<16x512xf32> to vector<16x256xf32>
    %cst_4 = arith.constant 0.000000e+00 : f32
    %8 = vector.broadcast %cst_4 : f32 to vector<16x256xf32>
    %9 = arith.subf %8, %6 : vector<16x256xf32>
    %10 = math.exp %9 : vector<16x256xf32>
    %cst_5 = arith.constant 1.000000e+00 : f32
    %11 = vector.broadcast %cst_5 : f32 to vector<16x256xf32>
    %12 = arith.addf %11, %10 : vector<16x256xf32>
    %13 = tpu.reciprocal %12 {approx = true} : vector<16x256xf32> -> vector<16x256xf32>
    %14 = arith.mulf %6, %13 : vector<16x256xf32>
    %15 = arith.mulf %14, %7 : vector<16x256xf32>
    %c0_6 = arith.constant 0 : index
    %c0_7 = arith.constant 0 : index
    %16 = vector.load %arg6[%c0_6, %c0_7] : memref<16x256xf32, #tpu.memory_space<vmem>>, vector<16x256xf32>
    %c0_8 = arith.constant 0 : index
    %c0_9 = arith.constant 0 : index
    %17 = vector.load %arg4[%c0_8, %c0_9] : memref<256x256xf32, #tpu.memory_space<vmem>>, vector<256x256xf32>
    %cst_10 = arith.constant dense<0.000000e+00> : vector<16x256xf32>
    %18 = tpu.matmul %15, %17, %cst_10 {dimension_numbers = #tpu.dot_dimension_numbers<[1], [0], [0], [1], [0, 0, 1, 1], [], []>} : vector<16x256xf32>, vector<256x256xf32>, vector<16x256xf32> -> vector<16x256xf32>
    %19 = arith.addf %16, %18 : vector<16x256xf32>
    %c0_11 = arith.constant 0 : index
    %c0_12 = arith.constant 0 : index
    %20 = vector.load %arg6[%c0_11, %c0_12] : memref<16x256xf32, #tpu.memory_space<vmem>>, vector<16x256xf32>
    tpu.vector_store %arg6[%c0_11, %c0_12], %19 {strides = array<i32>} : memref<16x256xf32, #tpu.memory_space<vmem>>, vector<16x256xf32>,
    %c2_i32 = arith.constant 2 : i32
    %21 = arith.cmpi eq, %arg1, %c2_i32 : i32
    %22 = arith.extui %21 : i1 to i32
    %c0_i32_13 = arith.constant 0 : i32
    %23 = arith.cmpi ne, %22, %c0_i32_13 : i32
    scf.if %23 {
      %c0_14 = arith.constant 0 : index
      %c0_15 = arith.constant 0 : index
      %24 = vector.load %arg6[%c0_14, %c0_15] : memref<16x256xf32, #tpu.memory_space<vmem>>, vector<16x256xf32>
      %c0_16 = arith.constant 0 : index
      %c0_17 = arith.constant 0 : index
      %25 = vector.load %arg5[%c0_16, %c0_17] : memref<16x256xf32, #tpu.memory_space<vmem>>, vector<16x256xf32>
      tpu.vector_store %arg5[%c0_16, %c0_17], %24 {strides = array<i32>} : memref<16x256xf32, #tpu.memory_space<vmem>>, vector<16x256xf32>,
    } else {
    }
    return
  }
  func.func @transform_0(%arg0: i32, %arg1: i32) -> (i32, i32) {
    %c0_i32 = arith.constant 0 : i32
    %c0_i32_0 = arith.constant 0 : i32
    return %arg0, %c0_i32 : i32, i32
  }
  func.func @transform_1(%arg0: i32, %arg1: i32) -> (i32, i32) {
    %c0_i32 = arith.constant 0 : i32
    %c0_i32_0 = arith.constant 0 : i32
    return %c0_i32, %arg1 : i32, i32
  }
  func.func @transform_2(%arg0: i32, %arg1: i32) -> (i32, i32) {
    %c0_i32 = arith.constant 0 : i32
    %c0_i32_0 = arith.constant 0 : i32
    return %arg1, %c0_i32 : i32, i32
  }
  func.func @transform_3(%arg0: i32, %arg1: i32) -> (i32, i32) {
    %c0_i32 = arith.constant 0 : i32
    %c0_i32_0 = arith.constant 0 : i32
    return %arg0, %c0_i32 : i32, i32
  }
}

</mosaic_0001>

<bundles_post_ra>
// kernel: _ffn_pallas.1
= control target key start
LH: loop header
LB: loop body
LE: loop exit
PB: predicated region body
PF: predicated region fallthrough
CT: control target
= control target key end

     0   :  { %8 = vsyncpa [#allocation5], 0  ;;  %s1487_s12 = smov 0   ;;  %s1489_s13 = smov 0   ;;  %s2051_s0 = inlined_call_operand.vmem [shape: f32[16,256], index: 0, kind: input, shape index: {}]   ;;  %s2052_s1 = inlined_call_operand.vmem [shape: f32[256,1536], index: 1, kind: input, shape index: {}]   ;;  %s2053_s2 = inlined_call_operand.vmem [shape: f32[768,256], index: 2, kind: input, shape index: {}]   ;;  %s2054_s3 = inlined_call_operand.hbm [shape: f32[16,256], index: 3, kind: output, shape index: {}]  }
   0x1   :  { %s1491_s14 = smov 0   ;;  %s1493_s15 = smov 0  }
   0x2   :  { %s1495_s16 = smov 0  }
   0x3 LB: > { %s1083_s17 = sadd.s32 4294967295, %s1461_s16   ;;  %s23_s18 = sadd.s32 1, %s1457_s15  ;;  %s1461_s16 = sphi %s1495_s16, %s14_s16   ;;  %s1457_s15 = sphi %s1493_s15, %s2059_s15   ;;  %s1453_s14 = sphi %s1491_s14, %s2058_s14   ;;  %s1449_s13 = sphi %s1489_s13, %s2057_s13   ;;  %s1445_s12 = sphi %s1487_s12, %s2056_s12  }
   0x4   : > { %p24_p0 = scmp.ge.s32.totalorder %s23_s18, 3  ;;  %p66_p1 = scmp.ne.s32.totalorder %s1449_s13, %s1445_s12 }
   0x5   : > { %p67_p2 = scmp.eq.s32.totalorder %s1461_s16, 0  ;;  %s59_s20 = sadd.s32 1, %s1449_s13 }
   0x6   : > { %s2061_s18 = smov (%p24_p0, %s23_s18), 0  ;;  %p1086_p5 = scmp.ge.s32.totalorder %s1461_s16, 3 }
   0x7   : > { %p68_p3 = por %p67_p2, %p66_p1  ;;  %s56_s19 = ssub.s32 %s1457_s15, %s2061_s18 }
   0x8   : > { %p57_p4 = scmp.eq.s32.totalorder %s56_s19, 0  ;;  %154 = sbr.rel (%p1086_p5) target bundleno = 83 (0x53), region = 20 }
   0xa   : > { %s1523_s21 = scalar_select %p57_p4, %s1449_s13, %s59_s20  }
   0xf   : > { %157 = sbr.rel (!%p68_p3) target bundleno = 83 (0x53), region = 24  ;;  %s159_s22 = sand.u32 (%p68_p3), 1, %s1449_s13  }
  0x10   : > { %s1101_s23 = sshll.u32 (%p68_p3), %s1457_s15, 5  ;;  %s1087_s24 = sshll.u32 (%p68_p3), %s159_s22, 10 }
  0x11   : > { %s1531_s27 = scalar_lea.vmem (%p68_p3), %s2052_s1, %s1101_s23  ;;  %s1536_s28 = scalar_lea.vmem (%p68_p3), [#allocation3], %s1087_s24 }
  0x12   : > { %v177_v0 = vld [vmem:[%s1531_s27] sm:$0xff] (%p68_p3)  ;;  %v179_v1 = vld [vmem:[%s1531_s27 + $0x8] sm:$0xff] (%p68_p3)  ;;  %v181_v2 = vld [vmem:[%s1531_s27 + $0x10] sm:$0xff] (%p68_p3) }
  0x13   : > { %178 = vst [vmem:[%s1536_s28] sm:$0xff] (%p68_p3), %v177_v0  ;;  %180 = vst [vmem:[%s1536_s28 + $0x8] sm:$0xff] (%p68_p3), %v179_v1  ;;  %v183_v3 = vld [vmem:[%s1531_s27 + $0x18] sm:$0xff] (%p68_p3)  ;;  %v185_v4 = vld [vmem:[%s1531_s27 + $0x60] sm:$0xff] (%p68_p3) }
  0x14   : > { %182 = vst [vmem:[%s1536_s28 + $0x10] sm:$0xff] (%p68_p3), %v181_v2  ;;  %v187_v5 = vld [vmem:[%s1531_s27 + $0x68] sm:$0xff] (%p68_p3)  ;;  %184 = vst [vmem:[%s1536_s28 + $0x18] sm:$0xff] (%p68_p3), %v183_v3  ;;  %v189_v6 = vld [vmem:[%s1531_s27 + $0x70] sm:$0xff] (%p68_p3) }
  0x15   : > { %186 = vst [vmem:[%s1536_s28 + $0x20] sm:$0xff] (%p68_p3), %v185_v4  ;;  %188 = vst [vmem:[%s1536_s28 + $0x28] sm:$0xff] (%p68_p3), %v187_v5  ;;  %v191_v7 = vld [vmem:[%s1531_s27 + $0x78] sm:$0xff] (%p68_p3)  ;;  %v193_v8 = vld [vmem:[%s1531_s27 + $0xc0] sm:$0xff] (%p68_p3) }
  0x16   : > { %190 = vst [vmem:[%s1536_s28 + $0x30] sm:$0xff] %v189_v6  ;;  %192 = vst [vmem:[%s1536_s28 + $0x38] sm:$0xff] %v191_v7  ;;  %v195_v9 = vld [vmem:[%s1531_s27 + $0xc8] sm:$0xff]  ;;  %v197_v10 = vld [vmem:[%s1531_s27 + $0xd0] sm:$0xff] }
  0x17   : > { %194 = vst [vmem:[%s1536_s28 + $0x40] sm:$0xff] %v193_v8  ;;  %v199_v11 = vld [vmem:[%s1531_s27 + $0xd8] sm:$0xff]  ;;  %196 = vst [vmem:[%s1536_s28 + $0x48] sm:$0xff] %v195_v9  ;;  %v201_v12 = vld [vmem:[%s1531_s27 + $0x120] sm:$0xff] }
  0x18   : > { %198 = vst [vmem:[%s1536_s28 + $0x50] sm:$0xff] %v197_v10  ;;  %200 = vst [vmem:[%s1536_s28 + $0x58] sm:$0xff] %v199_v11  ;;  %v203_v13 = vld [vmem:[%s1531_s27 + $0x128] sm:$0xff]  ;;  %v205_v14 = vld [vmem:[%s1531_s27 + $0x130] sm:$0xff] }
  0x19   : > { %202 = vst [vmem:[%s1536_s28 + $0x60] sm:$0xff] %v201_v12  ;;  %204 = vst [vmem:[%s1536_s28 + $0x68] sm:$0xff] %v203_v13  ;;  %v207_v15 = vld [vmem:[%s1531_s27 + $0x138] sm:$0xff]  ;;  %v209_v16 = vld [vmem:[%s1531_s27 + $0x180] sm:$0xff] }
  0x1a   : > { %206 = vst [vmem:[%s1536_s28 + $0x70] sm:$0xff] %v205_v14  ;;  %v211_v17 = vld [vmem:[%s1531_s27 + $0x188] sm:$0xff]  ;;  %208 = vst [vmem:[%s1536_s28 + $0x78] sm:$0xff] %v207_v15  ;;  %v213_v18 = vld [vmem:[%s1531_s27 + $0x190] sm:$0xff] }
  0x1b   : > { %210 = vst [vmem:[%s1536_s28 + $0x80] sm:$0xff] %v209_v16  ;;  %212 = vst [vmem:[%s1536_s28 + $0x88] sm:$0xff] %v211_v17  ;;  %v215_v19 = vld [vmem:[%s1531_s27 + $0x198] sm:$0xff]  ;;  %v217_v20 = vld [vmem:[%s1531_s27 + $0x1e0] sm:$0xff] }
  0x1c   : > { %214 = vst [vmem:[%s1536_s28 + $0x90] sm:$0xff] %v213_v18  ;;  %216 = vst [vmem:[%s1536_s28 + $0x98] sm:$0xff] %v215_v19  ;;  %v219_v21 = vld [vmem:[%s1531_s27 + $0x1e8] sm:$0xff]  ;;  %v221_v22 = vld [vmem:[%s1531_s27 + $0x1f0] sm:$0xff] }
  0x1d   : > { %218 = vst [vmem:[%s1536_s28 + $0xa0] sm:$0xff] %v217_v20  ;;  %v223_v23 = vld [vmem:[%s1531_s27 + $0x1f8] sm:$0xff]  ;;  %220 = vst [vmem:[%s1536_s28 + $0xa8] sm:$0xff] %v219_v21  ;;  %v225_v24 = vld [vmem:[%s1531_s27 + $0x240] sm:$0xff] }
  0x1e   : > { %222 = vst [vmem:[%s1536_s28 + $0xb0] sm:$0xff] %v221_v22  ;;  %224 = vst [vmem:[%s1536_s28 + $0xb8] sm:$0xff] %v223_v23  ;;  %v227_v25 = vld [vmem:[%s1531_s27 + $0x248] sm:$0xff]  ;;  %v229_v26 = vld [vmem:[%s1531_s27 + $0x250] sm:$0xff] }
  0x1f   : > { %226 = vst [vmem:[%s1536_s28 + $0xc0] sm:$0xff] %v225_v24  ;;  %228 = vst [vmem:[%s1536_s28 + $0xc8] sm:$0xff] %v227_v25  ;;  %v231_v27 = vld [vmem:[%s1531_s27 + $0x258] sm:$0xff]  ;;  %v233_v28 = vld [vmem:[%s1531_s27 + $0x2a0] sm:$0xff] }
  0x20   : > { %230 = vst [vmem:[%s1536_s28 + $0xd0] sm:$0xff] %v229_v26  ;;  %v235_v29 = vld [vmem:[%s1531_s27 + $0x2a8] sm:$0xff]  ;;  %232 = vst [vmem:[%s1536_s28 + $0xd8] sm:$0xff] %v231_v27  ;;  %v237_v30 = vld [vmem:[%s1531_s27 + $0x2b0] sm:$0xff] }
  0x21   : > { %234 = vst [vmem:[%s1536_s28 + $0xe0] sm:$0xff] %v233_v28  ;;  %236 = vst [vmem:[%s1536_s28 + $0xe8] sm:$0xff] %v235_v29  ;;  %v239_v31 = vld [vmem:[%s1531_s27 + $0x2b8] sm:$0xff]  ;;  %v241_v32 = vld [vmem:[%s1531_s27 + $0x300] sm:$0xff] }
  0x22   : > { %238 = vst [vmem:[%s1536_s28 + $0xf0] sm:$0xff] %v237_v30  ;;  %240 = vst [vmem:[%s1536_s28 + $0xf8] sm:$0xff] %v239_v31  ;;  %v243_v33 = vld [vmem:[%s1531_s27 + $0x308] sm:$0xff]  ;;  %v245_v34 = vld [vmem:[%s1531_s27 + $0x310] sm:$0xff] }
  0x23   : > { %242 = vst [vmem:[%s1536_s28 + $0x100] sm:$0xff] %v241_v32  ;;  %v247_v35 = vld [vmem:[%s1531_s27 + $0x318] sm:$0xff]  ;;  %244 = vst [vmem:[%s1536_s28 + $0x108] sm:$0xff] %v243_v33  ;;  %v249_v36 = vld [vmem:[%s1531_s27 + $0x360] sm:$0xff] }
  0x24   : > { %246 = vst [vmem:[%s1536_s28 + $0x110] sm:$0xff] %v245_v34  ;;  %248 = vst [vmem:[%s1536_s28 + $0x118] sm:$0xff] %v247_v35  ;;  %v251_v37 = vld [vmem:[%s1531_s27 + $0x368] sm:$0xff]  ;;  %v253_v38 = vld [vmem:[%s1531_s27 + $0x370] sm:$0xff] }
  0x25   : > { %250 = vst [vmem:[%s1536_s28 + $0x120] sm:$0xff] %v249_v36  ;;  %252 = vst [vmem:[%s1536_s28 + $0x128] sm:$0xff] %v251_v37  ;;  %v255_v39 = vld [vmem:[%s1531_s27 + $0x378] sm:$0xff]  ;;  %v257_v40 = vld [vmem:[%s1531_s27 + $0x3c0] sm:$0xff] }
  0x26   : > { %254 = vst [vmem:[%s1536_s28 + $0x130] sm:$0xff] %v253_v38  ;;  %v259_v41 = vld [vmem:[%s1531_s27 + $0x3c8] sm:$0xff]  ;;  %256 = vst [vmem:[%s1536_s28 + $0x138] sm:$0xff] %v255_v39  ;;  %v261_v42 = vld [vmem:[%s1531_s27 + $0x3d0] sm:$0xff] }
  0x27   : > { %258 = vst [vmem:[%s1536_s28 + $0x140] sm:$0xff] %v257_v40  ;;  %260 = vst [vmem:[%s1536_s28 + $0x148] sm:$0xff] %v259_v41  ;;  %v263_v43 = vld [vmem:[%s1531_s27 + $0x3d8] sm:$0xff]  ;;  %v265_v44 = vld [vmem:[%s1531_s27 + $0x420] sm:$0xff] }
  0x28   : > { %262 = vst [vmem:[%s1536_s28 + $0x150] sm:$0xff] %v261_v42  ;;  %264 = vst [vmem:[%s1536_s28 + $0x158] sm:$0xff] %v263_v43  ;;  %v267_v45 = vld [vmem:[%s1531_s27 + $0x428] sm:$0xff]  ;;  %v269_v46 = vld [vmem:[%s1531_s27 + $0x430] sm:$0xff] }
  0x29   : > { %266 = vst [vmem:[%s1536_s28 + $0x160] sm:$0xff] %v265_v44  ;;  %v271_v47 = vld [vmem:[%s1531_s27 + $0x438] sm:$0xff]  ;;  %268 = vst [vmem:[%s1536_s28 + $0x168] sm:$0xff] %v267_v45  ;;  %v273_v48 = vld [vmem:[%s1531_s27 + $0x480] sm:$0xff] }
  0x2a   : > { %270 = vst [vmem:[%s1536_s28 + $0x170] sm:$0xff] %v269_v46  ;;  %272 = vst [vmem:[%s1536_s28 + $0x178] sm:$0xff] %v271_v47  ;;  %v275_v49 = vld [vmem:[%s1531_s27 + $0x488] sm:$0xff]  ;;  %v277_v50 = vld [vmem:[%s1531_s27 + $0x490] sm:$0xff] }
  0x2b   : > { %274 = vst [vmem:[%s1536_s28 + $0x180] sm:$0xff] %v273_v48  ;;  %276 = vst [vmem:[%s1536_s28 + $0x188] sm:$0xff] %v275_v49  ;;  %v279_v51 = vld [vmem:[%s1531_s27 + $0x498] sm:$0xff]  ;;  %v281_v52 = vld [vmem:[%s1531_s27 + $0x4e0] sm:$0xff] }
  0x2c   : > { %278 = vst [vmem:[%s1536_s28 + $0x190] sm:$0xff] %v277_v50  ;;  %v283_v53 = vld [vmem:[%s1531_s27 + $0x4e8] sm:$0xff]  ;;  %280 = vst [vmem:[%s1536_s28 + $0x198] sm:$0xff] %v279_v51  ;;  %v285_v54 = vld [vmem:[%s1531_s27 + $0x4f0] sm:$0xff] }
  0x2d   : > { %282 = vst [vmem:[%s1536_s28 + $0x1a0] sm:$0xff] %v281_v52  ;;  %284 = vst [vmem:[%s1536_s28 + $0x1a8] sm:$0xff] %v283_v53  ;;  %v287_v55 = vld [vmem:[%s1531_s27 + $0x4f8] sm:$0xff]  ;;  %v289_v56 = vld [vmem:[%s1531_s27 + $0x540] sm:$0xff] }
  0x2e   : > { %286 = vst [vmem:[%s1536_s28 + $0x1b0] sm:$0xff] %v285_v54  ;;  %288 = vst [vmem:[%s1536_s28 + $0x1b8] sm:$0xff] %v287_v55  ;;  %v291_v57 = vld [vmem:[%s1531_s27 + $0x548] sm:$0xff]  ;;  %v293_v58 = vld [vmem:[%s1531_s27 + $0x550] sm:$0xff] }
  0x2f   : > { %290 = vst [vmem:[%s1536_s28 + $0x1c0] sm:$0xff] %v289_v56  ;;  %v295_v59 = vld [vmem:[%s1531_s27 + $0x558] sm:$0xff]  ;;  %292 = vst [vmem:[%s1536_s28 + $0x1c8] sm:$0xff] %v291_v57  ;;  %v297_v60 = vld [vmem:[%s1531_s27 + $0x5a0] sm:$0xff] }
  0x30   : > { %294 = vst [vmem:[%s1536_s28 + $0x1d0] sm:$0xff] %v293_v58  ;;  %296 = vst [vmem:[%s1536_s28 + $0x1d8] sm:$0xff] %v295_v59  ;;  %v299_v61 = vld [vmem:[%s1531_s27 + $0x5a8] sm:$0xff]  ;;  %v301_v62 = vld [vmem:[%s1531_s27 + $0x5b0] sm:$0xff] }
  0x31   : > { %298 = vst [vmem:[%s1536_s28 + $0x1e0] sm:$0xff] %v297_v60  ;;  %300 = vst [vmem:[%s1536_s28 + $0x1e8] sm:$0xff] %v299_v61  ;;  %v303_v63 = vld [vmem:[%s1531_s27 + $0x5b8] sm:$0xff]  ;;  %v305_v0 = vld [vmem:[%s1531_s27 + $0x600] sm:$0xff] }
  0x32   : > { %302 = vst [vmem:[%s1536_s28 + $0x1f0] sm:$0xff] %v301_v62  ;;  %v307_v1 = vld [vmem:[%s1531_s27 + $0x608] sm:$0xff]  ;;  %304 = vst [vmem:[%s1536_s28 + $0x1f8] sm:$0xff] %v303_v63  ;;  %v309_v2 = vld [vmem:[%s1531_s27 + $0x610] sm:$0xff] }
  0x33   : > { %306 = vst [vmem:[%s1536_s28 + $0x200] sm:$0xff] %v305_v0  ;;  %308 = vst [vmem:[%s1536_s28 + $0x208] sm:$0xff] %v307_v1  ;;  %v311_v3 = vld [vmem:[%s1531_s27 + $0x618] sm:$0xff]  ;;  %v313_v4 = vld [vmem:[%s1531_s27 + $0x660] sm:$0xff] }
  0x34   : > { %310 = vst [vmem:[%s1536_s28 + $0x210] sm:$0xff] %v309_v2  ;;  %312 = vst [vmem:[%s1536_s28 + $0x218] sm:$0xff] %v311_v3  ;;  %v315_v5 = vld [vmem:[%s1531_s27 + $0x668] sm:$0xff]  ;;  %v317_v6 = vld [vmem:[%s1531_s27 + $0x670] sm:$0xff] }
  0x35   : > { %314 = vst [vmem:[%s1536_s28 + $0x220] sm:$0xff] %v313_v4  ;;  %v319_v7 = vld [vmem:[%s1531_s27 + $0x678] sm:$0xff]  ;;  %316 = vst [vmem:[%s1536_s28 + $0x228] sm:$0xff] %v315_v5  ;;  %v321_v8 = vld [vmem:[%s1531_s27 + $0x6c0] sm:$0xff] }
  0x36   : > { %318 = vst [vmem:[%s1536_s28 + $0x230] sm:$0xff] %v317_v6  ;;  %320 = vst [vmem:[%s1536_s28 + $0x238] sm:$0xff] %v319_v7  ;;  %v323_v9 = vld [vmem:[%s1531_s27 + $0x6c8] sm:$0xff]  ;;  %v325_v10 = vld [vmem:[%s1531_s27 + $0x6d0] sm:$0xff] }
  0x37   : > { %322 = vst [vmem:[%s1536_s28 + $0x240] sm:$0xff] %v321_v8  ;;  %324 = vst [vmem:[%s1536_s28 + $0x248] sm:$0xff] %v323_v9  ;;  %v327_v11 = vld [vmem:[%s1531_s27 + $0x6d8] sm:$0xff]  ;;  %v329_v12 = vld [vmem:[%s1531_s27 + $0x720] sm:$0xff] }
  0x38   : > { %326 = vst [vmem:[%s1536_s28 + $0x250] sm:$0xff] %v325_v10  ;;  %v331_v13 = vld [vmem:[%s1531_s27 + $0x728] sm:$0xff]  ;;  %328 = vst [vmem:[%s1536_s28 + $0x258] sm:$0xff] %v327_v11  ;;  %v333_v14 = vld [vmem:[%s1531_s27 + $0x730] sm:$0xff] }
  0x39   : > { %330 = vst [vmem:[%s1536_s28 + $0x260] sm:$0xff] %v329_v12  ;;  %332 = vst [vmem:[%s1536_s28 + $0x268] sm:$0xff] %v331_v13  ;;  %v335_v15 = vld [vmem:[%s1531_s27 + $0x738] sm:$0xff]  ;;  %v337_v16 = vld [vmem:[%s1531_s27 + $0x780] sm:$0xff] }
  0x3a   : > { %334 = vst [vmem:[%s1536_s28 + $0x270] sm:$0xff] %v333_v14  ;;  %336 = vst [vmem:[%s1536_s28 + $0x278] sm:$0xff] %v335_v15  ;;  %v339_v17 = vld [vmem:[%s1531_s27 + $0x788] sm:$0xff]  ;;  %v341_v18 = vld [vmem:[%s1531_s27 + $0x790] sm:$0xff] }
  0x3b   : > { %338 = vst [vmem:[%s1536_s28 + $0x280] sm:$0xff] %v337_v16  ;;  %v343_v19 = vld [vmem:[%s1531_s27 + $0x798] sm:$0xff]  ;;  %340 = vst [vmem:[%s1536_s28 + $0x288] sm:$0xff] %v339_v17  ;;  %v345_v20 = vld [vmem:[%s1531_s27 + $0x7e0] sm:$0xff] }
  0x3c   : > { %342 = vst [vmem:[%s1536_s28 + $0x290] sm:$0xff] %v341_v18  ;;  %344 = vst [vmem:[%s1536_s28 + $0x298] sm:$0xff] %v343_v19  ;;  %v347_v21 = vld [vmem:[%s1531_s27 + $0x7e8] sm:$0xff]  ;;  %v349_v22 = vld [vmem:[%s1531_s27 + $0x7f0] sm:$0xff] }
  0x3d   : > { %346 = vst [vmem:[%s1536_s28 + $0x2a0] sm:$0xff] %v345_v20  ;;  %348 = vst [vmem:[%s1536_s28 + $0x2a8] sm:$0xff] %v347_v21  ;;  %v351_v23 = vld [vmem:[%s1531_s27 + $0x7f8] sm:$0xff]  ;;  %v353_v24 = vld [vmem:[%s1531_s27 + $0x840] sm:$0xff] }
  0x3e   : > { %350 = vst [vmem:[%s1536_s28 + $0x2b0] sm:$0xff] %v349_v22  ;;  %v355_v25 = vld [vmem:[%s1531_s27 + $0x848] sm:$0xff]  ;;  %352 = vst [vmem:[%s1536_s28 + $0x2b8] sm:$0xff] %v351_v23  ;;  %v357_v26 = vld [vmem:[%s1531_s27 + $0x850] sm:$0xff] }
  0x3f   : > { %354 = vst [vmem:[%s1536_s28 + $0x2c0] sm:$0xff] %v353_v24  ;;  %356 = vst [vmem:[%s1536_s28 + $0x2c8] sm:$0xff] %v355_v25  ;;  %v359_v27 = vld [vmem:[%s1531_s27 + $0x858] sm:$0xff]  ;;  %v361_v28 = vld [vmem:[%s1531_s27 + $0x8a0] sm:$0xff] }
  0x40   : > { %358 = vst [vmem:[%s1536_s28 + $0x2d0] sm:$0xff] %v357_v26  ;;  %360 = vst [vmem:[%s1536_s28 + $0x2d8] sm:$0xff] %v359_v27  ;;  %v363_v29 = vld [vmem:[%s1531_s27 + $0x8a8] sm:$0xff]  ;;  %v365_v30 = vld [vmem:[%s1531_s27 + $0x8b0] sm:$0xff] }
  0x41   : > { %362 = vst [vmem:[%s1536_s28 + $0x2e0] sm:$0xff] %v361_v28  ;;  %v367_v31 = vld [vmem:[%s1531_s27 + $0x8b8] sm:$0xff]  ;;  %364 = vst [vmem:[%s1536_s28 + $0x2e8] sm:$0xff] %v363_v29  ;;  %v369_v32 = vld [vmem:[%s1531_s27 + $0x900] sm:$0xff] }
  0x42   : > { %366 = vst [vmem:[%s1536_s28 + $0x2f0] sm:$0xff] %v365_v30  ;;  %368 = vst [vmem:[%s1536_s28 + $0x2f8] sm:$0xff] %v367_v31  ;;  %v371_v33 = vld [vmem:[%s1531_s27 + $0x908] sm:$0xff]  ;;  %v373_v34 = vld [vmem:[%s1531_s27 + $0x910] sm:$0xff] }
  0x43   : > { %370 = vst [vmem:[%s1536_s28 + $0x300] sm:$0xff] %v369_v32  ;;  %372 = vst [vmem:[%s1536_s28 + $0x308] sm:$0xff] %v371_v33  ;;  %v375_v35 = vld [vmem:[%s1531_s27 + $0x918] sm:$0xff]  ;;  %v377_v36 = vld [vmem:[%s1531_s27 + $0x960] sm:$0xff] }
  0x44   : > { %374 = vst [vmem:[%s1536_s28 + $0x310] sm:$0xff] %v373_v34  ;;  %v379_v37 = vld [vmem:[%s1531_s27 + $0x968] sm:$0xff]  ;;  %376 = vst [vmem:[%s1536_s28 + $0x318] sm:$0xff] %v375_v35  ;;  %v381_v38 = vld [vmem:[%s1531_s27 + $0x970] sm:$0xff] }
  0x45   : > { %378 = vst [vmem:[%s1536_s28 + $0x320] sm:$0xff] %v377_v36  ;;  %380 = vst [vmem:[%s1536_s28 + $0x328] sm:$0xff] %v379_v37  ;;  %v383_v39 = vld [vmem:[%s1531_s27 + $0x978] sm:$0xff]  ;;  %v385_v40 = vld [vmem:[%s1531_s27 + $0x9c0] sm:$0xff] }
  0x46   : > { %382 = vst [vmem:[%s1536_s28 + $0x330] sm:$0xff] %v381_v38  ;;  %384 = vst [vmem:[%s1536_s28 + $0x338] sm:$0xff] %v383_v39  ;;  %v387_v41 = vld [vmem:[%s1531_s27 + $0x9c8] sm:$0xff]  ;;  %v389_v42 = vld [vmem:[%s1531_s27 + $0x9d0] sm:$0xff] }
  0x47   : > { %386 = vst [vmem:[%s1536_s28 + $0x340] sm:$0xff] %v385_v40  ;;  %v391_v43 = vld [vmem:[%s1531_s27 + $0x9d8] sm:$0xff]  ;;  %388 = vst [vmem:[%s1536_s28 + $0x348] sm:$0xff] %v387_v41  ;;  %v393_v44 = vld [vmem:[%s1531_s27 + $0xa20] sm:$0xff] }
  0x48   : > { %390 = vst [vmem:[%s1536_s28 + $0x350] sm:$0xff] %v389_v42  ;;  %392 = vst [vmem:[%s1536_s28 + $0x358] sm:$0xff] %v391_v43  ;;  %v395_v45 = vld [vmem:[%s1531_s27 + $0xa28] sm:$0xff]  ;;  %v397_v46 = vld [vmem:[%s1531_s27 + $0xa30] sm:$0xff] }
  0x49   : > { %394 = vst [vmem:[%s1536_s28 + $0x360] sm:$0xff] %v393_v44  ;;  %396 = vst [vmem:[%s1536_s28 + $0x368] sm:$0xff] %v395_v45  ;;  %v399_v47 = vld [vmem:[%s1531_s27 + $0xa38] sm:$0xff]  ;;  %v401_v48 = vld [vmem:[%s1531_s27 + $0xa80] sm:$0xff] }
  0x4a   : > { %398 = vst [vmem:[%s1536_s28 + $0x370] sm:$0xff] %v397_v46  ;;  %v403_v49 = vld [vmem:[%s1531_s27 + $0xa88] sm:$0xff]  ;;  %400 = vst [vmem:[%s1536_s28 + $0x378] sm:$0xff] %v399_v47  ;;  %v405_v50 = vld [vmem:[%s1531_s27 + $0xa90] sm:$0xff] }
  0x4b   : > { %402 = vst [vmem:[%s1536_s28 + $0x380] sm:$0xff] %v401_v48  ;;  %404 = vst [vmem:[%s1536_s28 + $0x388] sm:$0xff] %v403_v49  ;;  %v407_v51 = vld [vmem:[%s1531_s27 + $0xa98] sm:$0xff]  ;;  %v409_v52 = vld [vmem:[%s1531_s27 + $0xae0] sm:$0xff] }
  0x4c   : > { %406 = vst [vmem:[%s1536_s28 + $0x390] sm:$0xff] %v405_v50  ;;  %408 = vst [vmem:[%s1536_s28 + $0x398] sm:$0xff] %v407_v51  ;;  %v411_v53 = vld [vmem:[%s1531_s27 + $0xae8] sm:$0xff]  ;;  %v413_v54 = vld [vmem:[%s1531_s27 + $0xaf0] sm:$0xff] }
  0x4d   : > { %410 = vst [vmem:[%s1536_s28 + $0x3a0] sm:$0xff] %v409_v52  ;;  %v415_v55 = vld [vmem:[%s1531_s27 + $0xaf8] sm:$0xff]  ;;  %412 = vst [vmem:[%s1536_s28 + $0x3a8] sm:$0xff] %v411_v53  ;;  %v417_v56 = vld [vmem:[%s1531_s27 + $0xb40] sm:$0xff] }
  0x4e   : > { %414 = vst [vmem:[%s1536_s28 + $0x3b0] sm:$0xff] %v413_v54  ;;  %416 = vst [vmem:[%s1536_s28 + $0x3b8] sm:$0xff] %v415_v55  ;;  %v419_v57 = vld [vmem:[%s1531_s27 + $0xb48] sm:$0xff]  ;;  %v421_v58 = vld [vmem:[%s1531_s27 + $0xb50] sm:$0xff] }
  0x4f   : > { %418 = vst [vmem:[%s1536_s28 + $0x3c0] sm:$0xff] %v417_v56  ;;  %420 = vst [vmem:[%s1536_s28 + $0x3c8] sm:$0xff] %v419_v57  ;;  %v423_v59 = vld [vmem:[%s1531_s27 + $0xb58] sm:$0xff]  ;;  %v425_v60 = vld [vmem:[%s1531_s27 + $0xba0] sm:$0xff] }
  0x50   : > { %422 = vst [vmem:[%s1536_s28 + $0x3d0] sm:$0xff] %v421_v58  ;;  %v427_v61 = vld [vmem:[%s1531_s27 + $0xba8] sm:$0xff]  ;;  %424 = vst [vmem:[%s1536_s28 + $0x3d8] sm:$0xff] %v423_v59  ;;  %v429_v62 = vld [vmem:[%s1531_s27 + $0xbb0] sm:$0xff] }
  0x51   : > { %426 = vst [vmem:[%s1536_s28 + $0x3e0] sm:$0xff] %v425_v60  ;;  %428 = vst [vmem:[%s1536_s28 + $0x3e8] sm:$0xff] %v427_v61  ;;  %v431_v63 = vld [vmem:[%s1531_s27 + $0xbb8] sm:$0xff] }
  0x52   : > { %430 = vst [vmem:[%s1536_s28 + $0x3f0] sm:$0xff] %v429_v62  ;;  %432 = vst [vmem:[%s1536_s28 + $0x3f8] sm:$0xff] %v431_v63 }
  0x53 PF: > { %p1090_p6 = scmp.ge.s32.totalorder %s1461_s16, 1  ;;  %p447_p7 = scmp.lt.s32.totalorder %s1461_s16, 4 }
  0x55   : > { %p448_p8 = pnand %p1090_p6, %p447_p7 }
  0x56   : > { %s454_s29 = sand.u32 (!%p448_p8), 1, %s1445_s12   ;;  %s1092_s30 = sshll.u32 (!%p448_p8), %s1453_s14, 5 }
  0x57   : > { %451 = sbr.rel (%p448_p8) target bundleno = 669 (0x29d), region = 51  ;;  %s1091_s4 = sshll.u32 (!%p448_p8), %s454_s29, 10 }
  0x58   : > { %p493_p9 = scmp.lt.s32.totalorder (!%p448_p8), %s1092_s30, 95  ;;  %s1800_s9 = scalar_lea.vmem (!%p448_p8), [#allocation3], %s1091_s4 }
  0x59   : > { %p1095_p10 = scmp.ne.s32.totalorder (!%p448_p8), %s1453_s14, 0 }
  0x5e   : > { %s2063_s30 = smov (!%p493_p9, %s1092_s30), 95  ;;  %503 = sbr.rel (%p1095_p10) target bundleno = 101 (0x65), region = 59 }
  0x5f   : > { %s1102_s5 = sshll.u32 %s2063_s30, 4  ;;  %v1463_v0 = vmov (!%p1095_p10), 0.0  }
  0x60   : > { %s1798_s8 = scalar_lea.vmem %s2053_s2, %s1102_s5  ;;  %504 = vst [vmem:[#allocation2] sm:$0xff] (!%p1095_p10), %v1463_v0  ;;  %505 = vst [vmem:[#allocation2 + $0x8] sm:$0xff] (!%p1095_p10), %v1463_v0 }
  0x61   : > { %506 = vst [vmem:[#allocation2 + $0x10] sm:$0xff] (!%p1095_p10), %v1463_v0  ;;  %507 = vst [vmem:[#allocation2 + $0x18] sm:$0xff] (!%p1095_p10), %v1463_v0 }
  0x65 PF: > { %v513_v1 = vld [vmem:[%s1800_s9 + $0x8] sm:$0xff]  ;;  %v512_v3 = vld [vmem:[%s1800_s9] sm:$0xff]  ;;  %v515_v26 = vld [vmem:[%s1800_s9 + $0x18] sm:$0xff]  ;;  %p1096_p11 = scmp.ne.s32.totalorder %s1453_s14, 2 }
  0x66   : > { %v517_v2 = vld [vmem:[%s1800_s9 + $0x28] sm:$0xff]  ;;  %v516_v5 = vld [vmem:[%s1800_s9 + $0x20] sm:$0xff]  ;;  %v519_v27 = vld [vmem:[%s1800_s9 + $0x38] sm:$0xff] }
  0x67   : > { %v1103_v4 = vpack.c.bf16 %v517_v2, %v513_v1  ;;  %v521_v6 = vld [vmem:[%s1800_s9 + $0x48] sm:$0xff]  ;;  %v1105_v8 = vpack.c.bf16 %v516_v5, %v512_v3  ;;  %v520_v10 = vld [vmem:[%s1800_s9 + $0x40] sm:$0xff]  ;;  %v514_v28 = vld [vmem:[%s1800_s9 + $0x10] sm:$0xff]  ;;  %v1167_v33 = vpack.c.bf16 %v519_v27, %v515_v26 }
  0x68   : > { %v525_v7 = vld [vmem:[%s1800_s9 + $0x68] sm:$0xff]  ;;  %v524_v11 = vld [vmem:[%s1800_s9 + $0x60] sm:$0xff]  ;;  %v518_v29 = vld [vmem:[%s1800_s9 + $0x30] sm:$0xff] }
  0x69   : > { %v1107_v9 = vpack.c.bf16 %v525_v7, %v521_v6  ;;  %v529_v12 = vld [vmem:[%s1800_s9 + $0x88] sm:$0xff]  ;;  %1104 = vmatprep.subr.bf16.mxu0 %v1103_v4  ;;  %v1109_v14 = vpack.c.bf16 %v524_v11, %v520_v10  ;;  %v528_v16 = vld [vmem:[%s1800_s9 + $0x80] sm:$0xff]  ;;  %v1169_v34 = vpack.c.bf16 %v518_v29, %v514_v28  ;;  %v523_v37 = vld [vmem:[%s1800_s9 + $0x58] sm:$0xff]  ;;  %1168 = vmatprep.subr.bf16.mxu1 %v1167_v33 }
  0x6a   : > { %v533_v13 = vld [vmem:[%s1800_s9 + $0xa8] sm:$0xff]  ;;  %1106 = vmatpush1.bf16.msra.mxu0 %v1105_v8  ;;  %v532_v17 = vld [vmem:[%s1800_s9 + $0xa0] sm:$0xff]  ;;  %v527_v38 = vld [vmem:[%s1800_s9 + $0x78] sm:$0xff] }
  0x6b   : > { %1108 = vmatprep.subr.bf16.mxu0 %v1107_v9  ;;  %v1111_v15 = vpack.c.bf16 %v533_v13, %v529_v12  ;;  %v537_v18 = vld [vmem:[%s1800_s9 + $0xc8] sm:$0xff]  ;;  %v1113_v20 = vpack.c.bf16 %v532_v17, %v528_v16  ;;  %v536_v22 = vld [vmem:[%s1800_s9 + $0xc0] sm:$0xff]  ;;  %v1171_v40 = vpack.c.bf16 %v527_v38, %v523_v37  ;;  %v522_v41 = vld [vmem:[%s1800_s9 + $0x50] sm:$0xff]  ;;  %1170 = vmatpush1.bf16.msra.mxu1 %v1169_v34 }
  0x6c   : > { %v541_v19 = vld [vmem:[%s1800_s9 + $0xe8] sm:$0xff]  ;;  %v540_v23 = vld [vmem:[%s1800_s9 + $0xe0] sm:$0xff]  ;;  %v526_v42 = vld [vmem:[%s1800_s9 + $0x70] sm:$0xff] }
  0x6d   : > { %v1115_v21 = vpack.c.bf16 %v541_v19, %v537_v18  ;;  %v545_v24 = vld [vmem:[%s1800_s9 + $0x108] sm:$0xff]  ;;  %v1117_v30 = vpack.c.bf16 %v540_v23, %v536_v22  ;;  %v544_v31 = vld [vmem:[%s1800_s9 + $0x100] sm:$0xff]  ;;  %v1173_v43 = vpack.c.bf16 %v526_v42, %v522_v41  ;;  %1172 = vmatprep.subr.bf16.mxu1 %v1171_v40  ;;  %v531_v45 = vld [vmem:[%s1800_s9 + $0x98] sm:$0xff] }
  0x6e   : > { %1110 = vmatpush1.bf16.msra.mxu0 %v1109_v14  ;;  %v549_v25 = vld [vmem:[%s1800_s9 + $0x128] sm:$0xff]  ;;  %v548_v32 = vld [vmem:[%s1800_s9 + $0x120] sm:$0xff]  ;;  %v535_v46 = vld [vmem:[%s1800_s9 + $0xb8] sm:$0xff] }
  0x6f   : > { %1112 = vmatprep.subr.bf16.mxu0 %v1111_v15  ;;  %v1119_v35 = vpack.c.bf16 %v549_v25, %v545_v24  ;;  %v553_v36 = vld [vmem:[%s1800_s9 + $0x148] sm:$0xff]  ;;  %v1121_v44 = vpack.c.bf16 %v548_v32, %v544_v31  ;;  %v530_v47 = vld [vmem:[%s1800_s9 + $0x90] sm:$0xff]  ;;  %v552_v49 = vld [vmem:[%s1800_s9 + $0x140] sm:$0xff]  ;;  %v1175_v51 = vpack.c.bf16 %v535_v46, %v531_v45  ;;  %1174 = vmatpush1.bf16.msra.mxu1 %v1173_v43 }
  0x70   : > { %v557_v39 = vld [vmem:[%s1800_s9 + $0x168] sm:$0xff]  ;;  %v556_v50 = vld [vmem:[%s1800_s9 + $0x160] sm:$0xff]  ;;  %v534_v52 = vld [vmem:[%s1800_s9 + $0xb0] sm:$0xff] }
  0x71   : > { %v1123_v48 = vpack.c.bf16 %v557_v39, %v553_v36  ;;  %v561_v53 = vld [vmem:[%s1800_s9 + $0x188] sm:$0xff]  ;;  %v539_v55 = vld [vmem:[%s1800_s9 + $0xd8] sm:$0xff]  ;;  %v1177_v56 = vpack.c.bf16 %v534_v52, %v530_v47  ;;  %v1125_v58 = vpack.c.bf16 %v556_v50, %v552_v49  ;;  %v560_v59 = vld [vmem:[%s1800_s9 + $0x180] sm:$0xff]  ;;  %1176 = vmatprep.subr.bf16.mxu1 %v1175_v51 }
  0x72   : > { %1114 = vmatpush1.bf16.msra.mxu0 %v1113_v20  ;;  %v565_v54 = vld [vmem:[%s1800_s9 + $0x1a8] sm:$0xff]  ;;  %v543_v57 = vld [vmem:[%s1800_s9 + $0xf8] sm:$0xff]  ;;  %v538_v61 = vld [vmem:[%s1800_s9 + $0xd0] sm:$0xff] }
  0x73   : > { %1116 = vmatprep.subr.bf16.mxu0 %v1115_v21  ;;  %v1179_v60 = vpack.c.bf16 %v543_v57, %v539_v55  ;;  %v542_v62 = vld [vmem:[%s1800_s9 + $0xf0] sm:$0xff]  ;;  %v1127_v63 = vpack.c.bf16 %v565_v54, %v561_v53  ;;  %v564_v0 = vld [vmem:[%s1800_s9 + $0x1a0] sm:$0xff]  ;;  %v547_v1 = vld [vmem:[%s1800_s9 + $0x118] sm:$0xff]  ;;  %1178 = vmatpush1.bf16.msra.mxu1 %v1177_v56 }
  0x74   : > { %v551_v2 = vld [vmem:[%s1800_s9 + $0x138] sm:$0xff]  ;;  %v569_v3 = vld [vmem:[%s1800_s9 + $0x1c8] sm:$0xff]  ;;  %v1181_v5 = vpack.c.bf16 %v542_v62, %v538_v61  ;;  %v1129_v6 = vpack.c.bf16 %v564_v0, %v560_v59  ;;  %v568_v7 = vld [vmem:[%s1800_s9 + $0x1c0] sm:$0xff] }
  0x75   : > { %v573_v4 = vld [vmem:[%s1800_s9 + $0x1e8] sm:$0xff]  ;;  %1180 = vmatprep.subr.bf16.mxu1 %v1179_v60  ;;  %v1183_v8 = vpack.c.bf16 %v551_v2, %v547_v1  ;;  %v546_v9 = vld [vmem:[%s1800_s9 + $0x110] sm:$0xff]  ;;  %v572_v12 = vld [vmem:[%s1800_s9 + $0x1e0] sm:$0xff] }
  0x76   : > { %1118 = vmatpush1.bf16.msra.mxu0 %v1117_v30  ;;  %v550_v10 = vld [vmem:[%s1800_s9 + $0x130] sm:$0xff]  ;;  %v1131_v11 = vpack.c.bf16 %v573_v4, %v569_v3  ;;  %v555_v13 = vld [vmem:[%s1800_s9 + $0x158] sm:$0xff]  ;;  %v577_v15 = vld [vmem:[%s1800_s9 + $0x208] sm:$0xff]  ;;  %v1133_v18 = vpack.c.bf16 %v572_v12, %v568_v7 }
  0x77   : > { %1120 = vmatprep.subr.bf16.mxu0 %v1119_v35  ;;  %v559_v14 = vld [vmem:[%s1800_s9 + $0x178] sm:$0xff]  ;;  %v581_v16 = vld [vmem:[%s1800_s9 + $0x228] sm:$0xff]  ;;  %1182 = vmatpush1.bf16.msra.mxu1 %v1181_v5  ;;  %v1185_v17 = vpack.c.bf16 %v550_v10, %v546_v9  ;;  %v576_v19 = vld [vmem:[%s1800_s9 + $0x200] sm:$0xff] }
  0x78   : > { %1184 = vmatprep.subr.bf16.mxu1 %v1183_v8  ;;  %v1187_v20 = vpack.c.bf16 %v559_v14, %v555_v13  ;;  %v554_v21 = vld [vmem:[%s1800_s9 + $0x150] sm:$0xff]  ;;  %v1135_v23 = vpack.c.bf16 %v581_v16, %v577_v15  ;;  %v580_v24 = vld [vmem:[%s1800_s9 + $0x220] sm:$0xff]  ;;  %v563_v25 = vld [vmem:[%s1800_s9 + $0x198] sm:$0xff] }
  0x79   : > { %v558_v22 = vld [vmem:[%s1800_s9 + $0x170] sm:$0xff]  ;;  %v567_v26 = vld [vmem:[%s1800_s9 + $0x1b8] sm:$0xff]  ;;  %v585_v27 = vld [vmem:[%s1800_s9 + $0x248] sm:$0xff]  ;;  %v1137_v31 = vpack.c.bf16 %v580_v24, %v576_v19 }
  0x7a   : > { %1122 = vmatpush1.bf16.msra.mxu0 %v1121_v44  ;;  %v589_v28 = vld [vmem:[%s1800_s9 + $0x268] sm:$0xff]  ;;  %v584_v29 = vld [vmem:[%s1800_s9 + $0x240] sm:$0xff]  ;;  %v1189_v30 = vpack.c.bf16 %v558_v22, %v554_v21  ;;  %v1191_v33 = vpack.c.bf16 %v567_v26, %v563_v25  ;;  %v562_v34 = vld [vmem:[%s1800_s9 + $0x190] sm:$0xff] }
  0x7b   : > { %1124 = vmatprep.subr.bf16.mxu0 %v1123_v48  ;;  %1186 = vmatpush1.bf16.msra.mxu1 %v1185_v17  ;;  %v588_v32 = vld [vmem:[%s1800_s9 + $0x260] sm:$0xff]  ;;  %v566_v35 = vld [vmem:[%s1800_s9 + $0x1b0] sm:$0xff]  ;;  %v1139_v36 = vpack.c.bf16 %v589_v28, %v585_v27  ;;  %v571_v37 = vld [vmem:[%s1800_s9 + $0x1d8] sm:$0xff] }
  0x7c   : > { %1188 = vmatprep.subr.bf16.mxu1 %v1187_v20  ;;  %v575_v38 = vld [vmem:[%s1800_s9 + $0x1f8] sm:$0xff]  ;;  %v509_v39 = vld [vmem:[%s2051_s0 + $0x8] sm:$0xff]  ;;  %v1193_v42 = vpack.c.bf16 %v566_v35, %v562_v34  ;;  %v1141_v43 = vpack.c.bf16 %v588_v32, %v584_v29  ;;  %v592_v44 = vld [vmem:[%s1800_s9 + $0x280] sm:$0xff] }
  0x7d   : > { %v593_v40 = vld [vmem:[%s1800_s9 + $0x288] sm:$0xff]  ;;  %704 = vmatprep.mubr.f32.mxu0 %v509_v39  ;;  %781 = vmatprep.mubr.f32.mxu1 %v509_v39  ;;  %v1195_v45 = vpack.c.bf16 %v575_v38, %v571_v37  ;;  %v570_v46 = vld [vmem:[%s1800_s9 + $0x1d0] sm:$0xff]  ;;  %v596_v49 = vld [vmem:[%s1800_s9 + $0x2a0] sm:$0xff] }
  0x7e   : > { %1126 = vmatpush1.bf16.msra.mxu0 %v1125_v58  ;;  %v597_v41 = vld [vmem:[%s1800_s9 + $0x2a8] sm:$0xff]  ;;  %v574_v47 = vld [vmem:[%s1800_s9 + $0x1f0] sm:$0xff]  ;;  %v579_v50 = vld [vmem:[%s1800_s9 + $0x218] sm:$0xff]  ;;  %v1145_v55 = vpack.c.bf16 %v596_v49, %v592_v44 }
  0x7f   : > { %1128 = vmatprep.subr.bf16.mxu0 %v1127_v63  ;;  %1190 = vmatpush1.bf16.msra.mxu1 %v1189_v30  ;;  %v1143_v48 = vpack.c.bf16 %v597_v41, %v593_v40  ;;  %v583_v51 = vld [vmem:[%s1800_s9 + $0x238] sm:$0xff]  ;;  %v601_v52 = vld [vmem:[%s1800_s9 + $0x2c8] sm:$0xff]  ;;  %v1197_v54 = vpack.c.bf16 %v574_v47, %v570_v46  ;;  %v600_v56 = vld [vmem:[%s1800_s9 + $0x2c0] sm:$0xff] }
  0x80   : > { %1192 = vmatprep.subr.bf16.mxu1 %v1191_v33  ;;  %v605_v53 = vld [vmem:[%s1800_s9 + $0x2e8] sm:$0xff]  ;;  %v1199_v57 = vpack.c.bf16 %v583_v51, %v579_v50  ;;  %v578_v58 = vld [vmem:[%s1800_s9 + $0x210] sm:$0xff]  ;;  %v604_v61 = vld [vmem:[%s1800_s9 + $0x2e0] sm:$0xff] }
  0x81   : > { %v582_v59 = vld [vmem:[%s1800_s9 + $0x230] sm:$0xff]  ;;  %v1147_v60 = vpack.c.bf16 %v605_v53, %v601_v52  ;;  %v587_v62 = vld [vmem:[%s1800_s9 + $0x258] sm:$0xff]  ;;  %v609_v0 = vld [vmem:[%s1800_s9 + $0x308] sm:$0xff]  ;;  %v1149_v3 = vpack.c.bf16 %v604_v61, %v600_v56 }
  0x82   : > { %1130 = vmatpush1.bf16.msra.mxu0 %v1129_v6  ;;  %v591_v63 = vld [vmem:[%s1800_s9 + $0x278] sm:$0xff]  ;;  %v613_v1 = vld [vmem:[%s1800_s9 + $0x328] sm:$0xff]  ;;  %v1201_v2 = vpack.c.bf16 %v582_v59, %v578_v58  ;;  %v608_v4 = vld [vmem:[%s1800_s9 + $0x300] sm:$0xff] }
  0x83   : > { %1132 = vmatprep.subr.bf16.mxu0 %v1131_v11  ;;  %1194 = vmatpush1.bf16.msra.mxu1 %v1193_v42  ;;  %v1203_v5 = vpack.c.bf16 %v591_v63, %v587_v62  ;;  %v586_v6 = vld [vmem:[%s1800_s9 + $0x250] sm:$0xff]  ;;  %v1151_v8 = vpack.c.bf16 %v613_v1, %v609_v0  ;;  %v612_v9 = vld [vmem:[%s1800_s9 + $0x320] sm:$0xff]  ;;  %v595_v10 = vld [vmem:[%s1800_s9 + $0x298] sm:$0xff] }
  0x84   : > { %1196 = vmatprep.subr.bf16.mxu1 %v1195_v45  ;;  %v590_v7 = vld [vmem:[%s1800_s9 + $0x270] sm:$0xff]  ;;  %v599_v11 = vld [vmem:[%s1800_s9 + $0x2b8] sm:$0xff]  ;;  %v617_v12 = vld [vmem:[%s1800_s9 + $0x348] sm:$0xff]  ;;  %v1153_v15 = vpack.c.bf16 %v612_v9, %v608_v4 }
  0x85   : > { %v621_v13 = vld [vmem:[%s1800_s9 + $0x368] sm:$0xff]  ;;  %v1205_v14 = vpack.c.bf16 %v590_v7, %v586_v6  ;;  %v616_v16 = vld [vmem:[%s1800_s9 + $0x340] sm:$0xff]  ;;  %v1207_v17 = vpack.c.bf16 %v599_v11, %v595_v10  ;;  %v598_v19 = vld [vmem:[%s1800_s9 + $0x2b0] sm:$0xff] }
  0x86   : > { %1134 = vmatpush1.bf16.msra.mxu0 %v1133_v18  ;;  %v594_v18 = vld [vmem:[%s1800_s9 + $0x290] sm:$0xff]  ;;  %v1155_v20 = vpack.c.bf16 %v621_v13, %v617_v12  ;;  %v620_v21 = vld [vmem:[%s1800_s9 + $0x360] sm:$0xff]  ;;  %v603_v22 = vld [vmem:[%s1800_s9 + $0x2d8] sm:$0xff] }
  0x87   : > { %1136 = vmatprep.subr.bf16.mxu0 %v1135_v23  ;;  %1198 = vmatpush1.bf16.msra.mxu1 %v1197_v54  ;;  %v607_v23 = vld [vmem:[%s1800_s9 + $0x2f8] sm:$0xff]  ;;  %v625_v24 = vld [vmem:[%s1800_s9 + $0x388] sm:$0xff]  ;;  %v1209_v26 = vpack.c.bf16 %v598_v19, %v594_v18  ;;  %v1157_v27 = vpack.c.bf16 %v620_v21, %v616_v16  ;;  %v624_v28 = vld [vmem:[%s1800_s9 + $0x380] sm:$0xff] }
  0x88   : > { %1200 = vmatprep.subr.bf16.mxu1 %v1199_v57  ;;  %v629_v25 = vld [vmem:[%s1800_s9 + $0x3a8] sm:$0xff]  ;;  %v1211_v29 = vpack.c.bf16 %v607_v23, %v603_v22  ;;  %v602_v30 = vld [vmem:[%s1800_s9 + $0x2d0] sm:$0xff]  ;;  %v628_v33 = vld [vmem:[%s1800_s9 + $0x3a0] sm:$0xff] }
  0x89   : > { %v1159_v32 = vpack.c.bf16 %v629_v25, %v625_v24  ;;  %v611_v34 = vld [vmem:[%s1800_s9 + $0x318] sm:$0xff]  ;;  %v637_v37 = vld [vmem:[%s1800_s9 + $0x3e8] sm:$0xff]  ;;  %v1161_v39 = vpack.c.bf16 %v628_v33, %v624_v28  ;;  %v632_v40 = vld [vmem:[%s1800_s9 + $0x3c0] sm:$0xff] }
  0x8a   : > { %1138 = vmatpush1.bf16.msra.mxu0 %v1137_v31  ;;  %v606_v31 = vld [vmem:[%s1800_s9 + $0x2f0] sm:$0xff]  ;;  %v615_v35 = vld [vmem:[%s1800_s9 + $0x338] sm:$0xff]  ;;  %v636_v45 = vld [vmem:[%s1800_s9 + $0x3e0] sm:$0xff] }
  0x8b   : > { %1140 = vmatprep.subr.bf16.mxu0 %v1139_v36  ;;  %1202 = vmatpush1.bf16.msra.mxu1 %v1201_v2  ;;  %v633_v36 = vld [vmem:[%s1800_s9 + $0x3c8] sm:$0xff]  ;;  %v1213_v38 = vpack.c.bf16 %v606_v31, %v602_v30  ;;  %v1215_v41 = vpack.c.bf16 %v615_v35, %v611_v34  ;;  %v610_v42 = vld [vmem:[%s1800_s9 + $0x310] sm:$0xff]  ;;  %v619_v46 = vld [vmem:[%s1800_s9 + $0x358] sm:$0xff]  ;;  %v1165_v51 = vpack.c.bf16 %v636_v45, %v632_v40 }
  0x8c   : > { %1204 = vmatprep.subr.bf16.mxu1 %v1203_v5  ;;  %v1163_v44 = vpack.c.bf16 %v637_v37, %v633_v36  ;;  %v623_v47 = vld [vmem:[%s1800_s9 + $0x378] sm:$0xff]  ;;  %v618_v53 = vld [vmem:[%s1800_s9 + $0x350] sm:$0xff]  ;;  %v826_v58 = vld [vmem:[%s1798_s8] sm:$0xff] }
  0x8d   : > { %v829_v49 = vld [vmem:[%s1798_s8 + $0x18] sm:$0xff]  ;;  %v1219_v52 = vpack.c.bf16 %v623_v47, %v619_v46  ;;  %v622_v54 = vld [vmem:[%s1800_s9 + $0x370] sm:$0xff]  ;;  %v831_v61 = vld [vmem:[%s1798_s8 + $0x28] sm:$0xff] }
  0x8e   : > { %1142 = vmatpush1.bf16.msra.mxu0 %v1141_v43  ;;  %v614_v43 = vld [vmem:[%s1800_s9 + $0x330] sm:$0xff]  ;;  %v631_v56 = vld [vmem:[%s1800_s9 + $0x3b8] sm:$0xff]  ;;  %v508_v63 = vld [vmem:[%s2051_s0] sm:$0xff] }
  0x8f   : > { %1144 = vmatprep.subr.bf16.mxu0 %v1143_v48  ;;  %1206 = vmatpush1.bf16.msra.mxu1 %v1205_v14  ;;  %v827_v48 = vld [vmem:[%s1798_s8 + $0x8] sm:$0xff]  ;;  %v1217_v50 = vpack.c.bf16 %v614_v43, %v610_v42  ;;  %v828_v59 = vld [vmem:[%s1798_s8 + $0x10] sm:$0xff]  ;;  %v833_v62 = vld [vmem:[%s1798_s8 + $0x38] sm:$0xff] }
  0x90   : > { %1208 = vmatprep.subr.bf16.mxu1 %v1207_v17  ;;  %v1231_v57 = vpack.c.bf16 %v829_v49, %v827_v48  ;;  %v626_v1 = vld [vmem:[%s1800_s9 + $0x390] sm:$0xff]  ;;  %v635_v4 = vld [vmem:[%s1800_s9 + $0x3d8] sm:$0xff]  ;;  %v1233_v6 = vpack.c.bf16 %v828_v59, %v826_v58  ;;  %v1235_v7 = vpack.c.bf16 %v833_v62, %v831_v61  ;;  %v835_v11 = vld [vmem:[%s1798_s8 + $0x48] sm:$0xff] }
  0x91   : > { %v630_v2 = vld [vmem:[%s1800_s9 + $0x3b0] sm:$0xff]  ;;  %v639_v5 = vld [vmem:[%s1800_s9 + $0x3f8] sm:$0xff]  ;;  %v834_v19 = vld [vmem:[%s1798_s8 + $0x40] sm:$0xff] }
  0x92   : > { %1146 = vmatpush1.bf16.msra.mxu0 %v1145_v55  ;;  %v627_v55 = vld [vmem:[%s1800_s9 + $0x398] sm:$0xff]  ;;  %v832_v9 = vld [vmem:[%s1798_s8 + $0x30] sm:$0xff]  ;;  %v1225_v10 = vpack.c.bf16 %v630_v2, %v626_v1  ;;  %v1227_v14 = vpack.c.bf16 %v639_v5, %v635_v4  ;;  %v839_v22 = vld [vmem:[%s1798_s8 + $0x68] sm:$0xff] }
  0x93   : > { %1148 = vmatprep.subr.bf16.mxu0 %v1147_v60  ;;  %1210 = vmatpush1.bf16.msra.mxu1 %v1209_v26  ;;  %v1221_v60 = vpack.c.bf16 %v622_v54, %v618_v53  ;;  %v1223_v0 = vpack.c.bf16 %v631_v56, %v627_v55  ;;  %v837_v12 = vld [vmem:[%s1798_s8 + $0x58] sm:$0xff]  ;;  %v510_v13 = vld [vmem:[%s2051_s0 + $0x10] sm:$0xff]  ;;  %v838_v26 = vld [vmem:[%s1798_s8 + $0x60] sm:$0xff] }
  0x94   : > { %1212 = vmatprep.subr.bf16.mxu1 %v1211_v29  ;;  %v638_v16 = vld [vmem:[%s1800_s9 + $0x3f0] sm:$0xff]  ;;  %v1239_v18 = vpack.c.bf16 %v837_v12, %v835_v11  ;;  %v841_v23 = vld [vmem:[%s1798_s8 + $0x78] sm:$0xff]  ;;  %v843_v28 = vld [vmem:[%s1798_s8 + $0x88] sm:$0xff] }
  0x95   : > { %v1243_v25 = vpack.c.bf16 %v841_v23, %v839_v22  ;;  %v845_v29 = vld [vmem:[%s1798_s8 + $0x98] sm:$0xff]  ;;  %v844_v33 = vld [vmem:[%s1798_s8 + $0x90] sm:$0xff]  ;;  %v847_v34 = vld [vmem:[%s1798_s8 + $0xa8] sm:$0xff] }
  0x96   : > { %1150 = vmatpush1.bf16.msra.mxu0 %v1149_v3  ;;  %v511_v3 = vld [vmem:[%s2051_s0 + $0x18] sm:$0xff]  ;;  %v1247_v31 = vpack.c.bf16 %v845_v29, %v843_v28  ;;  %v851_v40 = vld [vmem:[%s1798_s8 + $0xc8] sm:$0xff]  ;;  %v852_v45 = vld [vmem:[%s1798_s8 + $0xd0] sm:$0xff] }
  0x97   : > { %1152 = vmatprep.subr.bf16.mxu0 %v1151_v8  ;;  %1214 = vmatpush1.bf16.msra.mxu1 %v1213_v38  ;;  %v830_v8 = vld [vmem:[%s1798_s8 + $0x20] sm:$0xff]  ;;  %v849_v35 = vld [vmem:[%s1798_s8 + $0xb8] sm:$0xff]  ;;  %v855_v46 = vld [vmem:[%s1798_s8 + $0xe8] sm:$0xff] }
  0x98   : > { %1216 = vmatprep.subr.bf16.mxu1 %v1215_v41  ;;  %v1237_v17 = vpack.c.bf16 %v832_v9, %v830_v8  ;;  %v1251_v37 = vpack.c.bf16 %v849_v35, %v847_v34  ;;  %v846_v38 = vld [vmem:[%s1798_s8 + $0xa0] sm:$0xff]  ;;  %v853_v41 = vld [vmem:[%s1798_s8 + $0xd8] sm:$0xff]  ;;  %v859_v53 = vld [vmem:[%s1798_s8 + $0x108] sm:$0xff] }
  0x99   : > { %v1255_v43 = vpack.c.bf16 %v853_v41, %v851_v40  ;;  %v857_v47 = vld [vmem:[%s1798_s8 + $0xf8] sm:$0xff]  ;;  %v858_v56 = vld [vmem:[%s1798_s8 + $0x100] sm:$0xff]  ;;  %v863_v59 = vld [vmem:[%s1798_s8 + $0x128] sm:$0xff] }
  0x9a   : > { %1154 = vmatpush1.bf16.msra.mxu0 %v1153_v15  ;;  %v634_v15 = vld [vmem:[%s1800_s9 + $0x3d0] sm:$0xff]  ;;  %v1259_v49 = vpack.c.bf16 %v857_v47, %v855_v46  ;;  %v861_v54 = vld [vmem:[%s1798_s8 + $0x118] sm:$0xff]  ;;  %v862_v62 = vld [vmem:[%s1798_s8 + $0x120] sm:$0xff] }
  0x9b   : > { %1156 = vmatprep.subr.bf16.mxu0 %v1155_v20  ;;  %1218 = vmatpush1.bf16.msra.mxu1 %v1217_v50  ;;  %v836_v20 = vld [vmem:[%s1798_s8 + $0x50] sm:$0xff]  ;;  %v1229_v21 = vpack.c.bf16 %v638_v16, %v634_v15  ;;  %v854_v50 = vld [vmem:[%s1798_s8 + $0xe0] sm:$0xff]  ;;  %v1263_v55 = vpack.c.bf16 %v861_v54, %v859_v53  ;;  %v867_v1 = vld [vmem:[%s1798_s8 + $0x148] sm:$0xff] }
  0x9c   : > { %1220 = vmatprep.subr.bf16.mxu1 %v1219_v52  ;;  %v1241_v24 = vpack.c.bf16 %v836_v20, %v834_v19  ;;  %v869_v2 = vld [vmem:[%s1798_s8 + $0x158] sm:$0xff]  ;;  %v866_v4 = vld [vmem:[%s1798_s8 + $0x140] sm:$0xff]  ;;  %v868_v5 = vld [vmem:[%s1798_s8 + $0x150] sm:$0xff] }
  0x9d   : > { %v873_v8 = vld [vmem:[%s1798_s8 + $0x178] sm:$0xff]  ;;  %v872_v11 = vld [vmem:[%s1798_s8 + $0x170] sm:$0xff]  ;;  %v874_v16 = vld [vmem:[%s1798_s8 + $0x180] sm:$0xff] }
  0x9e   : > { %1158 = vmatpush1.bf16.msra.mxu0 %v1157_v27  ;;  %v840_v27 = vld [vmem:[%s1798_s8 + $0x70] sm:$0xff]  ;;  %v879_v19 = vld [vmem:[%s1798_s8 + $0x1a8] sm:$0xff]  ;;  %v881_v20 = vld [vmem:[%s1798_s8 + $0x1b8] sm:$0xff] }
  0x9f   : > { %1160 = vmatprep.subr.bf16.mxu0 %v1159_v32  ;;  %1222 = vmatpush1.bf16.msra.mxu1 %v1221_v60  ;;  %v1245_v30 = vpack.c.bf16 %v840_v27, %v838_v26  ;;  %v842_v32 = vld [vmem:[%s1798_s8 + $0x80] sm:$0xff]  ;;  %v865_v60 = vld [vmem:[%s1798_s8 + $0x138] sm:$0xff]  ;;  %v880_v23 = vld [vmem:[%s1798_s8 + $0x1b0] sm:$0xff] }
  0xa0   : > { %1224 = vmatprep.subr.bf16.mxu1 %v1223_v0  ;;  %v1249_v36 = vpack.c.bf16 %v844_v33, %v842_v32  ;;  %v1267_v61 = vpack.c.bf16 %v865_v60, %v863_v59  ;;  %v878_v22 = vld [vmem:[%s1798_s8 + $0x1a0] sm:$0xff]  ;;  %v885_v26 = vld [vmem:[%s1798_s8 + $0x1d8] sm:$0xff]  ;;  %v884_v29 = vld [vmem:[%s1798_s8 + $0x1d0] sm:$0xff] }
  0xa1   : > { %v882_v28 = vld [vmem:[%s1798_s8 + $0x1c0] sm:$0xff]  ;;  %v889_v32 = vld [vmem:[%s1798_s8 + $0x1f8] sm:$0xff]  ;;  %v888_v35 = vld [vmem:[%s1798_s8 + $0x1f0] sm:$0xff] }
  0xa2   : > { %1162 = vmatpush1.bf16.msra.mxu0 %v1161_v39  ;;  %v848_v39 = vld [vmem:[%s1798_s8 + $0xb0] sm:$0xff]  ;;  %v886_v34 = vld [vmem:[%s1798_s8 + $0x1e0] sm:$0xff] }
  0xa3   : > { %1164 = vmatprep.subr.bf16.mxu0 %v1163_v44  ;;  %1226 = vmatpush1.bf16.msra.mxu1 %v1225_v10  ;;  %v1253_v42 = vpack.c.bf16 %v848_v39, %v846_v38  ;;  %v850_v44 = vld [vmem:[%s1798_s8 + $0xc0] sm:$0xff] }
  0xa4   : > { %1228 = vmatprep.subr.bf16.mxu1 %v1227_v14  ;;  %v1257_v48 = vpack.c.bf16 %v852_v45, %v850_v44  ;;  %v870_v10 = vld [vmem:[%s1798_s8 + $0x160] sm:$0xff]  ;;  %v877_v14 = vld [vmem:[%s1798_s8 + $0x198] sm:$0xff] }
  0xa5   : > { %v1277_v12 = vpack.c.bf16 %v872_v11, %v870_v10  ;;  %v823_v10 = vld [vmem:[#allocation2 + $0x8] sm:$0xff] }
  0xa6   : > { %1166 = vmatpush1.bf16.msra.mxu0 %v1165_v51  ;;  %v856_v51 = vld [vmem:[%s1798_s8 + $0xf0] sm:$0xff] }
  0xa7   : > { %1232 = vmatprep.subr.bf16.mxu0 %v1231_v57  ;;  %1230 = vmatpush1.bf16.msra.mxu1 %v1229_v21  ;;  %v1261_v52 = vpack.c.bf16 %v856_v51, %v854_v50  ;;  %v1283_v21 = vpack.c.bf16 %v881_v20, %v879_v19 }
  0xa8   : > { %1295 = vmatprep.subr.bf16.mxu1 %v1231_v57  ;;  %v860_v57 = vld [vmem:[%s1798_s8 + $0x110] sm:$0xff] }
  0xa9   : > { %705 = vmatmul.mubr.f32.vlgmr.msra.gmra.mrb[0].mxu0 %v508_v63  ;;  %v1265_v58 = vpack.c.bf16 %v860_v57, %v858_v56 }
  0xaa   : > { %710 = vmatprep.mubr.f32.mxu0 %v511_v3  ;;  %1234 = vmatpush1.bf16.msra.mxu0 %v1233_v6 }
  0xab   : > { %1236 = vmatprep.subr.bf16.mxu0 %v1235_v7  ;;  %782 = vmatmul.mubr.f32.vlgmr.msra.gmra.mrb[0].mxu1 %v508_v63  ;;  %v864_v63 = vld [vmem:[%s1798_s8 + $0x130] sm:$0xff] }
  0xac   : > { %787 = vmatprep.mubr.f32.mxu1 %v511_v3  ;;  %1311 = vmatpush1.bf16.msra.mxu1 %v1233_v6  ;;  %v1269_v0 = vpack.c.bf16 %v864_v63, %v862_v62  ;;  %v1271_v3 = vpack.c.bf16 %v869_v2, %v867_v1  ;;  %v1273_v6 = vpack.c.bf16 %v868_v5, %v866_v4 }
  0xad   : > { %711 = vmatmul.mubr.f32.gmra.mrb[2].mxu0 %v510_v13  ;;  %1296 = vmatprep.subr.bf16.mxu1 %v1235_v7  ;;  %v871_v7 = vld [vmem:[%s1798_s8 + $0x168] sm:$0xff] }
  0xae   : > { %1238 = vmatpush1.bf16.msra.mxu0 %v1237_v17  ;;  %v1275_v9 = vpack.c.bf16 %v873_v8, %v871_v7 }
  0xaf   : > { %1240 = vmatprep.subr.bf16.mxu0 %v1239_v18  ;;  %788 = vmatmul.mubr.f32.gmra.mrb[2].mxu1 %v510_v13  ;;  %v875_v13 = vld [vmem:[%s1798_s8 + $0x188] sm:$0xff] }
  0xb0   : > { %1312 = vmatpush1.bf16.msra.mxu1 %v1237_v17  ;;  %v1279_v15 = vpack.c.bf16 %v877_v14, %v875_v13  ;;  %v876_v17 = vld [vmem:[%s1798_s8 + $0x190] sm:$0xff] }
  0xb1   : > { %1297 = vmatprep.subr.bf16.mxu1 %v1239_v18  ;;  %v1281_v18 = vpack.c.bf16 %v876_v17, %v874_v16  ;;  %v825_v16 = vld [vmem:[#allocation2 + $0x18] sm:$0xff] }
  0xb2   : > { %1242 = vmatpush1.bf16.msra.mxu0 %v1241_v24 }
  0xb3   : > { %1244 = vmatprep.subr.bf16.mxu0 %v1243_v25 }
  0xb4   : > { %1313 = vmatpush1.bf16.msra.mxu1 %v1241_v24  ;;  %v1285_v24 = vpack.c.bf16 %v880_v23, %v878_v22 }
  0xb5   : > { %1298 = vmatprep.subr.bf16.mxu1 %v1243_v25  ;;  %v883_v25 = vld [vmem:[%s1798_s8 + $0x1c8] sm:$0xff] }
  0xb6   : > { %1246 = vmatpush1.bf16.msra.mxu0 %v1245_v30  ;;  %v1287_v27 = vpack.c.bf16 %v885_v26, %v883_v25 }
  0xb7   : > { %1248 = vmatprep.subr.bf16.mxu0 %v1247_v31 }
  0xb8   : > { %1314 = vmatpush1.bf16.msra.mxu1 %v1245_v30  ;;  %v1289_v30 = vpack.c.bf16 %v884_v29, %v882_v28 }
  0xb9   : > { %1299 = vmatprep.subr.bf16.mxu1 %v1247_v31  ;;  %v887_v31 = vld [vmem:[%s1798_s8 + $0x1e8] sm:$0xff] }
  0xba   : > { %1250 = vmatpush1.bf16.msra.mxu0 %v1249_v36  ;;  %v1291_v33 = vpack.c.bf16 %v889_v32, %v887_v31 }
  0xbb   : > { %1252 = vmatprep.subr.bf16.mxu0 %v1251_v37 }
  0xbc   : > { %1315 = vmatpush1.bf16.msra.mxu1 %v1249_v36  ;;  %v1293_v36 = vpack.c.bf16 %v888_v35, %v886_v34 }
  0xbd   : > { %1300 = vmatprep.subr.bf16.mxu1 %v1251_v37 }
  0xbe   : > { %1254 = vmatpush1.bf16.msra.mxu0 %v1253_v42 }
  0xbf   : > { %1256 = vmatprep.subr.bf16.mxu0 %v1255_v43 }
  0xc0   : > { %1316 = vmatpush1.bf16.msra.mxu1 %v1253_v42 }
  0xc1   : > { %1301 = vmatprep.subr.bf16.mxu1 %v1255_v43 }
  0xc2   : > { %1258 = vmatpush1.bf16.msra.mxu0 %v1257_v48 }
  0xc3   : > { %1260 = vmatprep.subr.bf16.mxu0 %v1259_v49 }
  0xc4   : > { %1317 = vmatpush1.bf16.msra.mxu1 %v1257_v48 }
  0xc5   : > { %1302 = vmatprep.subr.bf16.mxu1 %v1259_v49 }
  0xc6   : > { %1262 = vmatpush1.bf16.msra.mxu0 %v1261_v52 }
  0xc7   : > { %1264 = vmatprep.subr.bf16.mxu0 %v1263_v55 }
  0xc8   : > { %1318 = vmatpush1.bf16.msra.mxu1 %v1261_v52 }
  0xc9   : > { %1303 = vmatprep.subr.bf16.mxu1 %v1263_v55 }
  0xca   : > { %1266 = vmatpush1.bf16.msra.mxu0 %v1265_v58 }
  0xcb   : > { %1268 = vmatprep.subr.bf16.mxu0 %v1267_v61 }
  0xcc   : > { %1319 = vmatpush1.bf16.msra.mxu1 %v1265_v58 }
  0xcd   : > { %1304 = vmatprep.subr.bf16.mxu1 %v1267_v61 }
  0xce   : > { %1270 = vmatpush1.bf16.msra.mxu0 %v1269_v0 }
  0xcf   : > { %1272 = vmatprep.subr.bf16.mxu0 %v1271_v3 }
  0xd0   : > { %1320 = vmatpush1.bf16.msra.mxu1 %v1269_v0 }
  0xd1   : > { %1305 = vmatprep.subr.bf16.mxu1 %v1271_v3 }
  0xd2   : > { %1274 = vmatpush1.bf16.msra.mxu0 %v1273_v6 }
  0xd3   : > { %1276 = vmatprep.subr.bf16.mxu0 %v1275_v9 }
  0xd4   : > { %1321 = vmatpush1.bf16.msra.mxu1 %v1273_v6 }
  0xd5   : > { %1306 = vmatprep.subr.bf16.mxu1 %v1275_v9  ;;  %v822_v9 = vld [vmem:[#allocation2] sm:$0xff] }
  0xd6   : > { %1278 = vmatpush1.bf16.msra.mxu0 %v1277_v12 }
  0xd7   : > { %1280 = vmatprep.subr.bf16.mxu0 %v1279_v15 }
  0xd8   : > { %1322 = vmatpush1.bf16.msra.mxu1 %v1277_v12 }
  0xd9   : > { %1307 = vmatprep.subr.bf16.mxu1 %v1279_v15  ;;  %v824_v15 = vld [vmem:[#allocation2 + $0x10] sm:$0xff] }
  0xda   : > { %1282 = vmatpush1.bf16.msra.mxu0 %v1281_v18 }
  0xdb   : > { %1284 = vmatprep.subr.bf16.mxu0 %v1283_v21 }
  0xdc   : > { %1323 = vmatpush1.bf16.msra.mxu1 %v1281_v18 }
  0xdd   : > { %1308 = vmatprep.subr.bf16.mxu1 %v1283_v21 }
  0xde   : > { %1286 = vmatpush1.bf16.msra.mxu0 %v1285_v24 }
  0xdf   : > { %1288 = vmatprep.subr.bf16.mxu0 %v1287_v27 }
  0xe0   : > { %1324 = vmatpush1.bf16.msra.mxu1 %v1285_v24 }
  0xe1   : > { %1309 = vmatprep.subr.bf16.mxu1 %v1287_v27 }
  0xe2   : > { %1290 = vmatpush1.bf16.msra.mxu0 %v1289_v30 }
  0xe3   : > { %1292 = vmatprep.subr.bf16.mxu0 %v1291_v33 }
  0xe4   : > { %1325 = vmatpush1.bf16.msra.mxu1 %v1289_v30 }
  0xe5   : > { %1310 = vmatprep.subr.bf16.mxu1 %v1291_v33 }
  0xe6   : > { %1294 = vmatpush1.bf16.msra.mxu0 %v1293_v36 }
  0xe8   : > { %1326 = vmatpush1.bf16.msra.mxu1 %v1293_v36 }
 0x17c   : > { %v706_v37 = vpop.f32.mrb[0].mxu0 }
 0x17d   : > { %v794_v38 = vsub.f32 0.0, %v706_v37  ;;  %v708_v39 = vpop.f32.mrb[1].mxu0 }
 0x17e   : > { %v795_v40 = vsub.f32 0.0, %v708_v39  ;;  %v783_v49 = vpop.f32.mrb[0].mxu1 }
 0x17f   : > { %v798_v41 = vmul.f32 1.442695, %v794_v38  ;;  %v785_v50 = vpop.f32.mrb[1].mxu1 }
 0x180   : > { %v800_v42 = vmul.f32 1.442695, %v795_v40  ;;  %v712_v43 = vpop.f32.mrb[2].mxu0 }
 0x181   : > { %1377 = vpow2.f32 %v798_v41  ;;  %v796_v44 = vsub.f32 0.0, %v712_v43  ;;  %v714_v45 = vpop.f32.mrb[3].mxu0 }
 0x182   : > { %1379 = vpow2.f32 %v800_v42  ;;  %v797_v46 = vsub.f32 0.0, %v714_v45  ;;  %v789_v52 = vpop.f32.mrb[2].mxu1 }
 0x183   : > { %v802_v47 = vmul.f32 1.442695, %v796_v44  ;;  %v791_v55 = vpop.f32.mrb[3].mxu1 }
 0x184   : > { %v804_v48 = vmul.f32 1.442695, %v797_v46 }
 0x185   : > { %1381 = vpow2.f32 %v802_v47 }
 0x186   : > { %1383 = vpow2.f32 %v804_v48 }
 0x18b   : > { %v1378_v51 = vpop.eup %1377 }
 0x18c   : > { %v1380_v53 = vpop.eup %1379  ;;  %v806_v54 = vadd.f32 1.0, %v1378_v51 }
 0x18d   : > { %v807_v56 = vadd.f32 1.0, %v1380_v53 }
 0x18e   : > { %1385 = vrcp.f32 %v806_v54 }
 0x18f   : > { %v1382_v57 = vpop.eup %1381  ;;  %1387 = vrcp.f32 %v807_v56 }
 0x190   : > { %v1384_v58 = vpop.eup %1383  ;;  %v808_v59 = vadd.f32 1.0, %v1382_v57 }
 0x191   : > { %v809_v60 = vadd.f32 1.0, %v1384_v58 }
 0x192   : > { %1389 = vrcp.f32 %v808_v59 }
 0x193   : > { %1391 = vrcp.f32 %v809_v60 }
 0x198   : > { %v1386_v61 = vpop.eup %1385 }
 0x199   : > { %v1388_v62 = vpop.eup %1387  ;;  %v814_v63 = vmul.f32 %v1386_v61, %v706_v37 }
 0x19a   : > { %v815_v0 = vmul.f32 %v1388_v62, %v708_v39 }
 0x19b   : > { %v818_v1 = vmul.f32 %v814_v63, %v783_v49 }
 0x19c   : > { %v1390_v2 = vpop.eup %1389  ;;  %v819_v3 = vmul.f32 %v815_v0, %v785_v50 }
 0x19d   : > { %v1392_v4 = vpop.eup %1391  ;;  %v816_v5 = vmul.f32 %v1390_v2, %v712_v43 }
 0x19e   : > { %v817_v6 = vmul.f32 %v1392_v4, %v714_v45  ;;  %954 = vmatprep.mubr.f32.mxu0 %v819_v3 }
 0x19f   : > { %v820_v7 = vmul.f32 %v816_v5, %v789_v52  ;;  %955 = vmatmul.mubr.f32.vlgmr.msra.gmra.mrb[4].mxu0 %v818_v1 }
 0x1a0   : > { %v821_v8 = vmul.f32 %v817_v6, %v791_v55 }
 0x1a2   : > { %960 = vmatprep.mubr.f32.mxu1 %v821_v8 }
 0x1a3   : > { %961 = vmatmul.mubr.f32.vlgmr.msra.gmra.mrb[4].mxu1 %v820_v7 }
 0x272   : > { %v956_v11 = vpop.f32.mrb[4].mxu0 }
 0x273   : > { %v967_v12 = vadd.f32 %v956_v11, %v822_v9  ;;  %v958_v13 = vpop.f32.mrb[5].mxu0 }
 0x274   : > { %v968_v14 = vadd.f32 %v958_v13, %v823_v10  ;;  %978 = sbr.rel (%p1096_p11) target bundleno = 643 (0x283), region = 63 }
 0x275   : > { %971 = vst [vmem:[#allocation2] sm:$0xff] %v967_v12 }
 0x276   : > { %972 = vst [vmem:[#allocation2 + $0x8] sm:$0xff] %v968_v14  ;;  %v962_v17 = vpop.f32.mrb[4].mxu1 }
 0x277   : > { %v969_v18 = vadd.f32 %v962_v17, %v824_v15  ;;  %v964_v19 = vpop.f32.mrb[5].mxu1 }
 0x278   : > { %v970_v20 = vadd.f32 %v964_v19, %v825_v16 }
 0x279   : > { %973 = vst [vmem:[#allocation2 + $0x10] sm:$0xff] %v969_v18 }
 0x27a   : > { %974 = vst [vmem:[#allocation2 + $0x18] sm:$0xff] %v970_v20 }
 0x27c   : > { %v979_v21 = vld [vmem:[#allocation2] sm:$0xff] }
 0x27d   : > { %v980_v22 = vld [vmem:[#allocation2 + $0x8] sm:$0xff]  ;;  %983 = vst [vmem:[#allocation4] sm:$0xff] %v979_v21 }
 0x27e   : > { %984 = vst [vmem:[#allocation4 + $0x8] sm:$0xff] %v980_v22 }
 0x280   : > { %v981_v23 = vld [vmem:[#allocation2 + $0x10] sm:$0xff] }
 0x281   : > { %985 = vst [vmem:[#allocation4 + $0x10] sm:$0xff] %v981_v23  ;;  %v982_v24 = vld [vmem:[#allocation2 + $0x18] sm:$0xff] }
 0x282   : > { %986 = vst [vmem:[#allocation4 + $0x18] sm:$0xff] %v982_v24 }
 0x283 PF: > { %p2010_p12 = scmp.eq.s32.totalorder %s1083_s17, 2  ;;  %s1464_s26 = smov [#allocation4]  }
 0x284   : > { %s997_s27 = sshll.u32 %s1464_s26, 4  ;;  %s998_s27 = int_to_ptr.vmem [resolvable:$true] %s997_s27 }
 0x285   : > { %s1393_s14 = scalar_lea.vmem %s998_s27, 512  ;;  %p1400_p2 = scmp.lt.s32.totalorder %s998_s27, %s998_s27 }
 0x286   : > { %p1394_p13 = scmp.ne.s32.totalorder %s998_s27, %s1393_s14  ;;  %p1401_p3 = scmp.lt.s32.totalorder %s1393_s14, %s1393_s14 }
 0x288   : > { %p1395_p0 = pnand %p1394_p13, %p2010_p12  ;;  %p1402_p4 = por %p1401_p3, %p1400_p2 }
 0x28a   : > { %p1396_p1 = pneg %p1395_p0 }
 0x28c   : > { %p1403_p5 = pnand %p1402_p4, %p1396_p1 }
 0x28e   : > { %1406 = shalt.err (!%p1403_p5)
}
 0x28f   : > { %s1407_s17 = scalar_lea.hbm %s2054_s3, 512 }
 0x290   : > { %p1408_p6 = scmp.ne.s32.totalorder %s2054_s3, %s1407_s17  ;;  %p1413_p9 = scmp.lt.u32.totalorder %s1407_s17, %s2054_s3 }
 0x292   : > { %p1409_p7 = pnand %p1408_p6, %p2010_p12 }
 0x294   : > { %p1410_p8 = pneg %p1409_p7 }
 0x296   : > { %p1415_p10 = pnand %p1413_p9, %p1410_p8 }
 0x298   : > { %1418 = shalt.err (!%p1415_p10)
}
 0x299   : > { %s1465_s7 = smov 256   ;;  %s1466_s8 = smov 16  }
 0x29a   : > { %1328 = dma.vmem_to_hbm [thread:$0]  (%p2010_p12), %s998_s27, 512, %s2054_s3, [#allocation5], %s1465_s7, %s1465_s7, %s1466_s8  }
 0x29b   : > { %1440 = dma.done.wait (%p2010_p12), [#allocation5], 512  }
 0x29c   : > { %1442 = vsyncadd (%p2010_p12), [#allocation5], 4294966784 }
 0x29d PF: > { %s14_s16 = sadd.s32 1, %s1461_s16   ;;  %s2056_s12 = smov %s1449_s13 }
 0x29e   : > { %p11_p11 = scmp.ge.s32.totalorder %s14_s16, 5   ;;  %s2057_s13 = smov %s1523_s21 }
 0x29f   : > { %s2058_s14 = smov %s1457_s15  ;;  %s2059_s15 = smov %s2061_s18 }
 0x2a0   :  { %13 = sbr.rel (!%p11_p11) target bundleno = 3 (0x3), region = 102 }
 0x2a7   :  { %1013 = vsyncpa [#allocation5], 1 }
 0x2a8   :  { %1015 = vsyncpa [#allocation5 + $0x1], 1 }

</bundles_post_ra>
